<compile_context>
chip_gen: v7x
topology: tpu7x:2x2x1
jax: 0.10.0
libtpu: 0.0.40
codegen_flags: <defaults>
</compile_context>

<pallas_src>
import functools

import jax
import jax.numpy as jnp
from jax import lax
from jax.experimental import pallas as pl
from jax.experimental.pallas import tpu as pltpu

_LANE = 128       # TPU lane width (last-dim granule)
_SUBLANE = 8      # TPU sublane granule (f32)
_NEG_INF = -1e30  # plain Python float (a jnp scalar would be a captured const)


def _round_up(x, m):
    return ((x + m - 1) // m) * m


# ----------------------------------------------------------------------------
# Fused kernel: L x (GATConv + ReLU) -> vectorized gather of (src,dst) -> MLP
# ----------------------------------------------------------------------------
def _policy_kernel(
    # VMEM inputs
    act_src_ref,      # (A, 1)  int32  action source node ids
    act_dst_ref,      # (A, 1)  int32  action destination node ids
    act_flag_ref,     # (A, 1)  f32    1.0 if action_type == 'addition'
    x_ref,            # (NP, DP) f32   padded node features
    adj_ref,          # (NP, NP) f32   adj[dst, src] (self-loops included)
    big_ref,          # (L+3, DP, DP) bf16: [W_0..W_{L-1}, w1a, w1b, w2]
    small_ref,        # (16, DP) f32: rows 3l+0/1/2 = a_src/a_dst/bias of layer l,
                      #               rows 3L+0/1/2 = w1f / b1 / b2
    # output
    out_ref,          # (A, OUT_W) f32, scores in column 0
    *, num_layers):
    np_ = adj_ref.shape[0]
    out_w = out_ref.shape[1]

    small = small_ref[...]                       # (16, DP) f32 — tiny, stays in vregs
    small_b = small.astype(jnp.bfloat16)         # hoisted bf16 copy for MXU use
    dims_nt = (((1,), (1,)), ((), ()))           # contract last dims: A @ B.T

    h = x_ref[...]
    for layer in range(num_layers):
        hb = h.astype(jnp.bfloat16)
        # Node transform z = h @ W   (MXU, bf16 in / f32 acc)
        z = jnp.dot(hb, big_ref[layer], preferred_element_type=jnp.float32)
        zb = z.astype(jnp.bfloat16)

        a_dst_row = small[3 * layer + 1:3 * layer + 2, :]          # (1, DP) f32
        bias_row = small[3 * layer + 2:3 * layer + 3, :]           # (1, DP) f32

        # e_src as a lane row via the A @ B.T pattern (row 3*layer of the result)
        e_all = lax.dot_general(small_b, zb, dims_nt,
                                preferred_element_type=jnp.float32)  # (16, NP)
        e_src = e_all[3 * layer:3 * layer + 1, :]                    # (1, NP)
        # e_dst as a sublane column via multiply + lane reduce
        e_dst = jnp.sum(z * a_dst_row, axis=-1, keepdims=True)       # (NP, 1)

        # logits[i, j] = e_dst[i] + e_src[j]   (i = destination, j = source)
        logits = e_dst + e_src
        logits = jnp.where(logits >= 0.0, logits, 0.2 * logits)      # LeakyReLU(0.2)

        # Masked softmax over incoming edges of each destination node.
        masked = jnp.where(adj_ref[...] > 0.0, logits, _NEG_INF)
        row_max = jnp.max(masked, axis=-1, keepdims=True)
        p = jnp.exp(masked - row_max)                                # 0 for masked entries
        denom = jnp.sum(p, axis=-1, keepdims=True)                   # > 0 (self-loops)
        alpha = p / denom                                            # exact division
        agg = jnp.dot(alpha.astype(jnp.bfloat16), zb,
                      preferred_element_type=jnp.float32)
        h = jnp.maximum(agg + bias_row, 0.0)                         # GAT bias + F.relu

    # Vectorized per-action gather: one-hot selectors from a broadcast compare,
    # gather with bf16 MXU matmuls (h never leaves VMEM).
    hb = h.astype(jnp.bfloat16)
    node_ids = lax.broadcasted_iota(jnp.int32, (1, np_), 1)
    sel_src = (node_ids == act_src_ref[...]).astype(jnp.bfloat16)    # (A, NP)
    sel_dst = (node_ids == act_dst_ref[...]).astype(jnp.bfloat16)    # (A, NP)
    h_src = jnp.dot(sel_src, hb, preferred_element_type=jnp.float32)
    h_dst = jnp.dot(sel_dst, hb, preferred_element_type=jnp.float32)

    r0 = 3 * num_layers
    w1f_row = small[r0 + 0:r0 + 1, :]                                # (1, DP)
    b1_row = small[r0 + 1:r0 + 2, :]                                 # (1, DP)
    b2_row = small[r0 + 2:r0 + 3, :out_w]                            # (1, OUT_W)
    w1a = big_ref[num_layers]                                        # (DP, DP) bf16
    w1b = big_ref[num_layers + 1]
    w2 = big_ref[num_layers + 2][:, :out_w]                          # (DP, OUT_W)

    # Scoring MLP: cat([h_src, h_dst, flag]) distributed over weight blocks.
    hid = (jnp.dot(h_src.astype(jnp.bfloat16), w1a, preferred_element_type=jnp.float32)
           + jnp.dot(h_dst.astype(jnp.bfloat16), w1b, preferred_element_type=jnp.float32)
           + act_flag_ref[...] * w1f_row
           + b1_row)
    hid = jnp.maximum(hid, 0.0)
    # Lane-dense output tile: scores live in column 0 of a 128-wide block.
    out_ref[...] = jnp.dot(hid.astype(jnp.bfloat16), w2,
                           preferred_element_type=jnp.float32) + b2_row


def _full_spec(arr):
    zeros = (0,) * arr.ndim
    return pl.BlockSpec(arr.shape, lambda i: zeros)


def _fused_policy_call(act_src, act_dst, act_flag, x_pad, adj_pad,
                       big_stack, small_stack, *, num_layers):
    a_pad = act_flag.shape[0]
    out_w = _LANE
    kernel = functools.partial(_policy_kernel, num_layers=num_layers)
    inputs = (act_src, act_dst, act_flag, x_pad, adj_pad, big_stack, small_stack)
    # TODO(synk): batching multiple graphs / action sets would add a leading
    # "parallel" grid axis here (second TensorCore on v7x, 256-row MXU tiles).
    return pl.pallas_call(
        kernel,
        out_shape=jax.ShapeDtypeStruct((a_pad, out_w), jnp.float32),
        grid=(1,),
        in_specs=[_full_spec(arr) for arr in inputs],
        out_specs=pl.BlockSpec((a_pad, out_w), lambda i: (0, 0)),
        compiler_params=pltpu.CompilerParams(
            dimension_semantics=("arbitrary",)),
    )(*inputs)


# ----------------------------------------------------------------------------
# Parameter init (synthetic), padding/packing, and forward glue.
# ----------------------------------------------------------------------------
def init_params(key, input_dim, hidden_dim, gnn_layers):
    params = {"gat": []}
    dims = [input_dim] + [hidden_dim] * gnn_layers
    for layer in range(gnn_layers):
        key, kw, ks, kd, kb = jax.random.split(key, 5)
        fan_in = dims[layer]
        params["gat"].append({
            "w": jax.random.normal(kw, (fan_in, hidden_dim), jnp.float32) / jnp.sqrt(fan_in),
            "a_src": jax.random.normal(ks, (hidden_dim, 1), jnp.float32) * 0.1,
            "a_dst": jax.random.normal(kd, (hidden_dim, 1), jnp.float32) * 0.1,
            "b": jax.random.normal(kb, (1, hidden_dim), jnp.float32) * 0.01,
        })
    key, k1, k2, k3, k4 = jax.random.split(key, 5)
    in_mlp = hidden_dim * 2 + 1
    params["w1"] = jax.random.normal(k1, (in_mlp, hidden_dim), jnp.float32) / jnp.sqrt(in_mlp)
    params["b1"] = jax.random.normal(k2, (1, hidden_dim), jnp.float32) * 0.01
    params["w2"] = jax.random.normal(k3, (hidden_dim, 1), jnp.float32) / jnp.sqrt(hidden_dim)
    params["b2"] = jax.random.normal(k4, (1, 1), jnp.float32) * 0.01
    return params


def prepare_params(params, input_dim, hidden_dim):
    """Pack all weights into one bf16 stack and all small rows into one f32 stack."""
    h = hidden_dim
    num_layers = len(params["gat"])
    dp = _round_up(max(input_dim, hidden_dim), _LANE)

    big, small_rows = [], []
    for layer in params["gat"]:
        w = layer["w"]
        fan_in = w.shape[0]
        big.append(jnp.zeros((dp, dp), jnp.float32).at[:fan_in, :h].set(w))
        small_rows.append(jnp.zeros((dp,), jnp.float32).at[:h].set(layer["a_src"][:, 0]))
        small_rows.append(jnp.zeros((dp,), jnp.float32).at[:h].set(layer["a_dst"][:, 0]))
        small_rows.append(jnp.zeros((dp,), jnp.float32).at[:h].set(layer["b"][0]))

    w1, b1, w2, b2 = params["w1"], params["b1"], params["w2"], params["b2"]
    big.append(jnp.zeros((dp, dp), jnp.float32).at[:h, :h].set(w1[:h]))         # w1a
    big.append(jnp.zeros((dp, dp), jnp.float32).at[:h, :h].set(w1[h:2 * h]))    # w1b
    big.append(jnp.zeros((dp, dp), jnp.float32).at[:h, 0].set(w2[:, 0]))        # w2 -> col 0
    small_rows.append(jnp.zeros((dp,), jnp.float32).at[:h].set(w1[2 * h]))      # w1f
    small_rows.append(jnp.zeros((dp,), jnp.float32).at[:h].set(b1[0]))          # b1
    small_rows.append(jnp.zeros((dp,), jnp.float32).at[0].set(b2[0, 0]))        # b2 -> col 0

    rs = _round_up(len(small_rows), 2 * _SUBLANE)      # 16-row granule (bf16 tile)
    while len(small_rows) < rs:
        small_rows.append(jnp.zeros((dp,), jnp.float32))

    return {
        "big_stack": jnp.stack(big).astype(jnp.bfloat16),   # (L+3, dp, dp) bf16
        "small_stack": jnp.stack(small_rows),                # (16, dp) f32
        "num_layers": num_layers,
    }


def build_adjacency(edge_index, num_nodes, n_pad):
    # adj[dst, src] = 1.0 for a message src -> dst; self-loops on every row
    # (real nodes: add_self_loops=True; padding rows: keeps the softmax finite).
    del num_nodes
    src, dst = edge_index[0], edge_index[1]
    adj = jnp.zeros((n_pad, n_pad), jnp.float32)
    adj = adj.at[dst, src].set(1.0)
    idx = jnp.arange(n_pad)
    adj = adj.at[idx, idx].set(1.0)
    return adj


def policy_network_forward(padded, x, adj_pad, act_src, act_dst, act_flag,
                           *, num_layers):
    n, f = x.shape
    dp = padded["big_stack"].shape[2]
    np_ = adj_pad.shape[0]
    a = act_src.shape[0]
    a_pad = _round_up(max(a, _SUBLANE), _SUBLANE)

    x_pad = jnp.zeros((np_, dp), jnp.float32).at[:n, :f].set(x)
    src_pad = jnp.zeros((a_pad, 1), jnp.int32).at[:a, 0].set(act_src.astype(jnp.int32))
    dst_pad = jnp.zeros((a_pad, 1), jnp.int32).at[:a, 0].set(act_dst.astype(jnp.int32))
    flag_pad = jnp.zeros((a_pad, 1), jnp.float32).at[:a, 0].set(act_flag)

    out = _fused_policy_call(src_pad, dst_pad, flag_pad, x_pad, adj_pad,
                             padded["big_stack"], padded["small_stack"],
                             num_layers=num_layers)
    return out[:a, 0]                                       # (A,)


if __name__ == "__main__":
    key = jax.random.PRNGKey(0)

    num_nodes = 8
    input_feature_dim = 16
    hidden_dim = 32
    gnn_layers = 3
    num_edges = 12
    num_actions = 4

    key, kx, ke, ka, kf = jax.random.split(key, 5)
    x = jax.random.normal(kx, (num_nodes, input_feature_dim), jnp.float32)
    edge_index = jax.random.randint(ke, (2, num_edges), 0, num_nodes, jnp.int32)
    # actions: (action_type, (src, dst)) -> flag (1.0 = 'addition') + index pairs
    action_pairs = jax.random.randint(ka, (2, num_actions), 0, num_nodes, jnp.int32)
    act_src, act_dst = action_pairs[0], action_pairs[1]
    act_flag = (jax.random.uniform(kf, (num_actions,)) > 0.5).astype(jnp.float32)

    params = init_params(key, input_feature_dim, hidden_dim, gnn_layers)
    padded = prepare_params(params, input_feature_dim, hidden_dim)

    n_pad = _round_up(num_nodes, _LANE)
    adj = build_adjacency(edge_index, num_nodes, n_pad)

    fwd = jax.jit(functools.partial(policy_network_forward,
                                    num_layers=gnn_layers))
    scores = fwd(padded, x, adj, act_src, act_dst, act_flag)
    jax.block_until_ready(scores)
    assert scores.shape == (num_actions,)
    assert bool(jnp.all(jnp.isfinite(scores)))
    print("KERNEL_OK")
</pallas_src>

<mosaic_0001>
module attributes {stable_mosaic.version = 11 : i64} {
  func.func @_policy_kernel(%arg0: i32, %arg1: memref<8x1xi32, #tpu.memory_space<vmem>>, %arg2: memref<8x1xi32, #tpu.memory_space<vmem>>, %arg3: memref<8x1xf32, #tpu.memory_space<vmem>>, %arg4: memref<128x128xf32, #tpu.memory_space<vmem>>, %arg5: memref<128x128xf32, #tpu.memory_space<vmem>>, %arg6: memref<6x128x128xbf16, #tpu.memory_space<vmem>>, %arg7: memref<16x128xf32, #tpu.memory_space<vmem>>, %arg8: memref<8x128xf32, #tpu.memory_space<vmem>>) attributes {dimension_semantics = [#tpu.dimension_semantics<arbitrary>], iteration_bounds = array<i64: 1>, scalar_prefetch = 0 : i64, scratch_operands = 0 : i64, tpu.core_type = #tpu.core_type<tc>, window_params = [{pipeline_mode = #tpu.pipeline_mode<synchronous>, transform_indices = @transform_0, window_bounds = array<i64: 8, 1>}, {pipeline_mode = #tpu.pipeline_mode<synchronous>, transform_indices = @transform_1, window_bounds = array<i64: 8, 1>}, {pipeline_mode = #tpu.pipeline_mode<synchronous>, transform_indices = @transform_2, window_bounds = array<i64: 8, 1>}, {pipeline_mode = #tpu.pipeline_mode<synchronous>, transform_indices = @transform_3, window_bounds = array<i64: 128, 128>}, {pipeline_mode = #tpu.pipeline_mode<synchronous>, transform_indices = @transform_4, window_bounds = array<i64: 128, 128>}, {pipeline_mode = #tpu.pipeline_mode<synchronous>, transform_indices = @transform_5, window_bounds = array<i64: 6, 128, 128>}, {pipeline_mode = #tpu.pipeline_mode<synchronous>, transform_indices = @transform_6, window_bounds = array<i64: 16, 128>}, {pipeline_mode = #tpu.pipeline_mode<synchronous>, transform_indices = @transform_7, window_bounds = array<i64: 8, 128>}]} {
    %c0 = arith.constant 0 : index
    %c0_0 = arith.constant 0 : index
    %0 = vector.load %arg7[%c0, %c0_0] : memref<16x128xf32, #tpu.memory_space<vmem>>, vector<16x128xf32>
    %1 = arith.truncf %0 : vector<16x128xf32> to vector<16x128xbf16>
    %c0_1 = arith.constant 0 : index
    %c0_2 = arith.constant 0 : index
    %2 = vector.load %arg4[%c0_1, %c0_2] : memref<128x128xf32, #tpu.memory_space<vmem>>, vector<128x128xf32>
    %3 = arith.truncf %2 : vector<128x128xf32> to vector<128x128xbf16>
    %c0_3 = arith.constant 0 : index
    %c0_4 = arith.constant 0 : index
    %c0_5 = arith.constant 0 : index
    %4 = vector.load %arg6[%c0_3, %c0_4, %c0_5] : memref<6x128x128xbf16, #tpu.memory_space<vmem>>, vector<1x128x128xbf16>
    %5 = vector.shape_cast %4 : vector<1x128x128xbf16> to vector<128x128xbf16>
    %cst = arith.constant dense<0.000000e+00> : vector<128x128xf32>
    %6 = tpu.matmul %3, %5, %cst {dimension_numbers = #tpu.dot_dimension_numbers<[1], [0], [0], [1], [0, 0, 1, 1], [], []>} : vector<128x128xbf16>, vector<128x128xbf16>, vector<128x128xf32> -> vector<128x128xf32>
    %7 = arith.truncf %6 : vector<128x128xf32> to vector<128x128xbf16>
    %8 = vector.extract_strided_slice %0 {offsets = [1, 0], sizes = [1, 128], strides = [1, 1]} : vector<16x128xf32> to vector<1x128xf32>
    %9 = vector.extract_strided_slice %0 {offsets = [2, 0], sizes = [1, 128], strides = [1, 1]} : vector<16x128xf32> to vector<1x128xf32>
    %cst_6 = arith.constant dense<0.000000e+00> : vector<16x128xf32>
    %10 = tpu.matmul %1, %7, %cst_6 {dimension_numbers = #tpu.dot_dimension_numbers<[1], [1], [0], [0], [0, 0, 1, 0], [], []>} : vector<16x128xbf16>, vector<128x128xbf16>, vector<16x128xf32> -> vector<16x128xf32>
    %11 = vector.extract_strided_slice %10 {offsets = [0, 0], sizes = [1, 128], strides = [1, 1]} : vector<16x128xf32> to vector<1x128xf32>
    %12 = vector.broadcast %8 : vector<1x128xf32> to vector<128x128xf32>
    %13 = arith.mulf %6, %12 : vector<128x128xf32>
    %cst_7 = arith.constant dense<0.000000e+00> : vector<128xf32>
    %14 = vector.multi_reduction <add>, %13, %cst_7 [1] : vector<128x128xf32> to vector<128xf32>
    %15 = vector.shape_cast %14 : vector<128xf32> to vector<128x1xf32>
    %16 = vector.broadcast %15 : vector<128x1xf32> to vector<128x128xf32>
    %17 = vector.broadcast %11 : vector<1x128xf32> to vector<128x128xf32>
    %18 = arith.addf %16, %17 : vector<128x128xf32>
    %cst_8 = arith.constant 0.000000e+00 : f32
    %19 = vector.broadcast %cst_8 : f32 to vector<128x128xf32>
    %20 = arith.cmpf oge, %18, %19 : vector<128x128xf32>
    %cst_9 = arith.constant 2.000000e-01 : f32
    %21 = vector.broadcast %cst_9 : f32 to vector<128x128xf32>
    %22 = arith.mulf %21, %18 : vector<128x128xf32>
    %23 = arith.select %20, %18, %22 : vector<128x128xi1>, vector<128x128xf32>
    %c0_10 = arith.constant 0 : index
    %c0_11 = arith.constant 0 : index
    %24 = vector.load %arg5[%c0_10, %c0_11] : memref<128x128xf32, #tpu.memory_space<vmem>>, vector<128x128xf32>
    %cst_12 = arith.constant 0.000000e+00 : f32
    %25 = vector.broadcast %cst_12 : f32 to vector<128x128xf32>
    %26 = arith.cmpf ogt, %24, %25 : vector<128x128xf32>
    %cst_13 = arith.constant -1.000000e+30 : f32
    %27 = vector.broadcast %cst_13 : f32 to vector<128x128xf32>
    %28 = arith.select %26, %23, %27 : vector<128x128xi1>, vector<128x128xf32>
    %cst_14 = arith.constant dense<0xFF800000> : vector<128xf32>
    %29 = vector.multi_reduction <maximumf>, %28, %cst_14 [1] : vector<128x128xf32> to vector<128xf32>
    %30 = vector.shape_cast %29 : vector<128xf32> to vector<128x1xf32>
    %31 = vector.broadcast %30 : vector<128x1xf32> to vector<128x128xf32>
    %32 = arith.subf %28, %31 : vector<128x128xf32>
    %33 = math.exp %32 : vector<128x128xf32>
    %cst_15 = arith.constant dense<0.000000e+00> : vector<128xf32>
    %34 = vector.multi_reduction <add>, %33, %cst_15 [1] : vector<128x128xf32> to vector<128xf32>
    %35 = vector.shape_cast %34 : vector<128xf32> to vector<128x1xf32>
    %36 = vector.broadcast %35 : vector<128x1xf32> to vector<128x128xf32>
    %37 = arith.divf %33, %36 : vector<128x128xf32>
    %38 = arith.truncf %37 : vector<128x128xf32> to vector<128x128xbf16>
    %cst_16 = arith.constant dense<0.000000e+00> : vector<128x128xf32>
    %39 = tpu.matmul %38, %7, %cst_16 {dimension_numbers = #tpu.dot_dimension_numbers<[1], [0], [0], [1], [0, 0, 1, 1], [], []>} : vector<128x128xbf16>, vector<128x128xbf16>, vector<128x128xf32> -> vector<128x128xf32>
    %40 = vector.broadcast %9 : vector<1x128xf32> to vector<128x128xf32>
    %41 = arith.addf %39, %40 : vector<128x128xf32>
    %cst_17 = arith.constant 0.000000e+00 : f32
    %42 = vector.broadcast %cst_17 : f32 to vector<128x128xf32>
    %43 = arith.maximumf %41, %42 : vector<128x128xf32>
    %44 = arith.truncf %43 : vector<128x128xf32> to vector<128x128xbf16>
    %c1 = arith.constant 1 : index
    %c0_18 = arith.constant 0 : index
    %c0_19 = arith.constant 0 : index
    %45 = vector.load %arg6[%c1, %c0_18, %c0_19] : memref<6x128x128xbf16, #tpu.memory_space<vmem>>, vector<1x128x128xbf16>
    %46 = vector.shape_cast %45 : vector<1x128x128xbf16> to vector<128x128xbf16>
    %cst_20 = arith.constant dense<0.000000e+00> : vector<128x128xf32>
    %47 = tpu.matmul %44, %46, %cst_20 {dimension_numbers = #tpu.dot_dimension_numbers<[1], [0], [0], [1], [0, 0, 1, 1], [], []>} : vector<128x128xbf16>, vector<128x128xbf16>, vector<128x128xf32> -> vector<128x128xf32>
    %48 = arith.truncf %47 : vector<128x128xf32> to vector<128x128xbf16>
    %49 = vector.extract_strided_slice %0 {offsets = [4, 0], sizes = [1, 128], strides = [1, 1]} : vector<16x128xf32> to vector<1x128xf32>
    %50 = vector.extract_strided_slice %0 {offsets = [5, 0], sizes = [1, 128], strides = [1, 1]} : vector<16x128xf32> to vector<1x128xf32>
    %cst_21 = arith.constant dense<0.000000e+00> : vector<16x128xf32>
    %51 = tpu.matmul %1, %48, %cst_21 {dimension_numbers = #tpu.dot_dimension_numbers<[1], [1], [0], [0], [0, 0, 1, 0], [], []>} : vector<16x128xbf16>, vector<128x128xbf16>, vector<16x128xf32> -> vector<16x128xf32>
    %52 = vector.extract_strided_slice %51 {offsets = [3, 0], sizes = [1, 128], strides = [1, 1]} : vector<16x128xf32> to vector<1x128xf32>
    %53 = vector.broadcast %49 : vector<1x128xf32> to vector<128x128xf32>
    %54 = arith.mulf %47, %53 : vector<128x128xf32>
    %cst_22 = arith.constant dense<0.000000e+00> : vector<128xf32>
    %55 = vector.multi_reduction <add>, %54, %cst_22 [1] : vector<128x128xf32> to vector<128xf32>
    %56 = vector.shape_cast %55 : vector<128xf32> to vector<128x1xf32>
    %57 = vector.broadcast %56 : vector<128x1xf32> to vector<128x128xf32>
    %58 = vector.broadcast %52 : vector<1x128xf32> to vector<128x128xf32>
    %59 = arith.addf %57, %58 : vector<128x128xf32>
    %cst_23 = arith.constant 0.000000e+00 : f32
    %60 = vector.broadcast %cst_23 : f32 to vector<128x128xf32>
    %61 = arith.cmpf oge, %59, %60 : vector<128x128xf32>
    %cst_24 = arith.constant 2.000000e-01 : f32
    %62 = vector.broadcast %cst_24 : f32 to vector<128x128xf32>
    %63 = arith.mulf %62, %59 : vector<128x128xf32>
    %64 = arith.select %61, %59, %63 : vector<128x128xi1>, vector<128x128xf32>
    %c0_25 = arith.constant 0 : index
    %c0_26 = arith.constant 0 : index
    %65 = vector.load %arg5[%c0_25, %c0_26] : memref<128x128xf32, #tpu.memory_space<vmem>>, vector<128x128xf32>
    %cst_27 = arith.constant 0.000000e+00 : f32
    %66 = vector.broadcast %cst_27 : f32 to vector<128x128xf32>
    %67 = arith.cmpf ogt, %65, %66 : vector<128x128xf32>
    %cst_28 = arith.constant -1.000000e+30 : f32
    %68 = vector.broadcast %cst_28 : f32 to vector<128x128xf32>
    %69 = arith.select %67, %64, %68 : vector<128x128xi1>, vector<128x128xf32>
    %cst_29 = arith.constant dense<0xFF800000> : vector<128xf32>
    %70 = vector.multi_reduction <maximumf>, %69, %cst_29 [1] : vector<128x128xf32> to vector<128xf32>
    %71 = vector.shape_cast %70 : vector<128xf32> to vector<128x1xf32>
    %72 = vector.broadcast %71 : vector<128x1xf32> to vector<128x128xf32>
    %73 = arith.subf %69, %72 : vector<128x128xf32>
    %74 = math.exp %73 : vector<128x128xf32>
    %cst_30 = arith.constant dense<0.000000e+00> : vector<128xf32>
    %75 = vector.multi_reduction <add>, %74, %cst_30 [1] : vector<128x128xf32> to vector<128xf32>
    %76 = vector.shape_cast %75 : vector<128xf32> to vector<128x1xf32>
    %77 = vector.broadcast %76 : vector<128x1xf32> to vector<128x128xf32>
    %78 = arith.divf %74, %77 : vector<128x128xf32>
    %79 = arith.truncf %78 : vector<128x128xf32> to vector<128x128xbf16>
    %cst_31 = arith.constant dense<0.000000e+00> : vector<128x128xf32>
    %80 = tpu.matmul %79, %48, %cst_31 {dimension_numbers = #tpu.dot_dimension_numbers<[1], [0], [0], [1], [0, 0, 1, 1], [], []>} : vector<128x128xbf16>, vector<128x128xbf16>, vector<128x128xf32> -> vector<128x128xf32>
    %81 = vector.broadcast %50 : vector<1x128xf32> to vector<128x128xf32>
    %82 = arith.addf %80, %81 : vector<128x128xf32>
    %cst_32 = arith.constant 0.000000e+00 : f32
    %83 = vector.broadcast %cst_32 : f32 to vector<128x128xf32>
    %84 = arith.maximumf %82, %83 : vector<128x128xf32>
    %85 = arith.truncf %84 : vector<128x128xf32> to vector<128x128xbf16>
    %c2 = arith.constant 2 : index
    %c0_33 = arith.constant 0 : index
    %c0_34 = arith.constant 0 : index
    %86 = vector.load %arg6[%c2, %c0_33, %c0_34] : memref<6x128x128xbf16, #tpu.memory_space<vmem>>, vector<1x128x128xbf16>
    %87 = vector.shape_cast %86 : vector<1x128x128xbf16> to vector<128x128xbf16>
    %cst_35 = arith.constant dense<0.000000e+00> : vector<128x128xf32>
    %88 = tpu.matmul %85, %87, %cst_35 {dimension_numbers = #tpu.dot_dimension_numbers<[1], [0], [0], [1], [0, 0, 1, 1], [], []>} : vector<128x128xbf16>, vector<128x128xbf16>, vector<128x128xf32> -> vector<128x128xf32>
    %89 = arith.truncf %88 : vector<128x128xf32> to vector<128x128xbf16>
    %90 = vector.extract_strided_slice %0 {offsets = [7, 0], sizes = [1, 128], strides = [1, 1]} : vector<16x128xf32> to vector<1x128xf32>
    %91 = vector.extract_strided_slice %0 {offsets = [8, 0], sizes = [1, 128], strides = [1, 1]} : vector<16x128xf32> to vector<1x128xf32>
    %cst_36 = arith.constant dense<0.000000e+00> : vector<16x128xf32>
    %92 = tpu.matmul %1, %89, %cst_36 {dimension_numbers = #tpu.dot_dimension_numbers<[1], [1], [0], [0], [0, 0, 1, 0], [], []>} : vector<16x128xbf16>, vector<128x128xbf16>, vector<16x128xf32> -> vector<16x128xf32>
    %93 = vector.extract_strided_slice %92 {offsets = [6, 0], sizes = [1, 128], strides = [1, 1]} : vector<16x128xf32> to vector<1x128xf32>
    %94 = vector.broadcast %90 : vector<1x128xf32> to vector<128x128xf32>
    %95 = arith.mulf %88, %94 : vector<128x128xf32>
    %cst_37 = arith.constant dense<0.000000e+00> : vector<128xf32>
    %96 = vector.multi_reduction <add>, %95, %cst_37 [1] : vector<128x128xf32> to vector<128xf32>
    %97 = vector.shape_cast %96 : vector<128xf32> to vector<128x1xf32>
    %98 = vector.broadcast %97 : vector<128x1xf32> to vector<128x128xf32>
    %99 = vector.broadcast %93 : vector<1x128xf32> to vector<128x128xf32>
    %100 = arith.addf %98, %99 : vector<128x128xf32>
    %cst_38 = arith.constant 0.000000e+00 : f32
    %101 = vector.broadcast %cst_38 : f32 to vector<128x128xf32>
    %102 = arith.cmpf oge, %100, %101 : vector<128x128xf32>
    %cst_39 = arith.constant 2.000000e-01 : f32
    %103 = vector.broadcast %cst_39 : f32 to vector<128x128xf32>
    %104 = arith.mulf %103, %100 : vector<128x128xf32>
    %105 = arith.select %102, %100, %104 : vector<128x128xi1>, vector<128x128xf32>
    %c0_40 = arith.constant 0 : index
    %c0_41 = arith.constant 0 : index
    %106 = vector.load %arg5[%c0_40, %c0_41] : memref<128x128xf32, #tpu.memory_space<vmem>>, vector<128x128xf32>
    %cst_42 = arith.constant 0.000000e+00 : f32
    %107 = vector.broadcast %cst_42 : f32 to vector<128x128xf32>
    %108 = arith.cmpf ogt, %106, %107 : vector<128x128xf32>
    %cst_43 = arith.constant -1.000000e+30 : f32
    %109 = vector.broadcast %cst_43 : f32 to vector<128x128xf32>
    %110 = arith.select %108, %105, %109 : vector<128x128xi1>, vector<128x128xf32>
    %cst_44 = arith.constant dense<0xFF800000> : vector<128xf32>
    %111 = vector.multi_reduction <maximumf>, %110, %cst_44 [1] : vector<128x128xf32> to vector<128xf32>
    %112 = vector.shape_cast %111 : vector<128xf32> to vector<128x1xf32>
    %113 = vector.broadcast %112 : vector<128x1xf32> to vector<128x128xf32>
    %114 = arith.subf %110, %113 : vector<128x128xf32>
    %115 = math.exp %114 : vector<128x128xf32>
    %cst_45 = arith.constant dense<0.000000e+00> : vector<128xf32>
    %116 = vector.multi_reduction <add>, %115, %cst_45 [1] : vector<128x128xf32> to vector<128xf32>
    %117 = vector.shape_cast %116 : vector<128xf32> to vector<128x1xf32>
    %118 = vector.broadcast %117 : vector<128x1xf32> to vector<128x128xf32>
    %119 = arith.divf %115, %118 : vector<128x128xf32>
    %120 = arith.truncf %119 : vector<128x128xf32> to vector<128x128xbf16>
    %cst_46 = arith.constant dense<0.000000e+00> : vector<128x128xf32>
    %121 = tpu.matmul %120, %89, %cst_46 {dimension_numbers = #tpu.dot_dimension_numbers<[1], [0], [0], [1], [0, 0, 1, 1], [], []>} : vector<128x128xbf16>, vector<128x128xbf16>, vector<128x128xf32> -> vector<128x128xf32>
    %122 = vector.broadcast %91 : vector<1x128xf32> to vector<128x128xf32>
    %123 = arith.addf %121, %122 : vector<128x128xf32>
    %cst_47 = arith.constant 0.000000e+00 : f32
    %124 = vector.broadcast %cst_47 : f32 to vector<128x128xf32>
    %125 = arith.maximumf %123, %124 : vector<128x128xf32>
    %126 = arith.truncf %125 : vector<128x128xf32> to vector<128x128xbf16>
    %127 = tpu.iota {dimensions = array<i32: 1>} : vector<1x128xi32>
    %c0_48 = arith.constant 0 : index
    %c0_49 = arith.constant 0 : index
    %128 = vector.load %arg1[%c0_48, %c0_49] : memref<8x1xi32, #tpu.memory_space<vmem>>, vector<8x1xi32>
    %129 = vector.broadcast %127 : vector<1x128xi32> to vector<8x128xi32>
    %130 = vector.broadcast %128 : vector<8x1xi32> to vector<8x128xi32>
    %131 = arith.cmpi eq, %129, %130 : vector<8x128xi32>
    %132 = arith.extui %131 : vector<8x128xi1> to vector<8x128xi32>
    %133 = arith.sitofp %132 : vector<8x128xi32> to vector<8x128xf32>
    %134 = arith.truncf %133 : vector<8x128xf32> to vector<8x128xbf16>
    %c0_50 = arith.constant 0 : index
    %c0_51 = arith.constant 0 : index
    %135 = vector.load %arg2[%c0_50, %c0_51] : memref<8x1xi32, #tpu.memory_space<vmem>>, vector<8x1xi32>
    %136 = vector.broadcast %127 : vector<1x128xi32> to vector<8x128xi32>
    %137 = vector.broadcast %135 : vector<8x1xi32> to vector<8x128xi32>
    %138 = arith.cmpi eq, %136, %137 : vector<8x128xi32>
    %139 = arith.extui %138 : vector<8x128xi1> to vector<8x128xi32>
    %140 = arith.sitofp %139 : vector<8x128xi32> to vector<8x128xf32>
    %141 = arith.truncf %140 : vector<8x128xf32> to vector<8x128xbf16>
    %cst_52 = arith.constant dense<0.000000e+00> : vector<8x128xf32>
    %142 = tpu.matmul %134, %126, %cst_52 {dimension_numbers = #tpu.dot_dimension_numbers<[1], [0], [0], [1], [0, 0, 1, 1], [], []>} : vector<8x128xbf16>, vector<128x128xbf16>, vector<8x128xf32> -> vector<8x128xf32>
    %cst_53 = arith.constant dense<0.000000e+00> : vector<8x128xf32>
    %143 = tpu.matmul %141, %126, %cst_53 {dimension_numbers = #tpu.dot_dimension_numbers<[1], [0], [0], [1], [0, 0, 1, 1], [], []>} : vector<8x128xbf16>, vector<128x128xbf16>, vector<8x128xf32> -> vector<8x128xf32>
    %144 = vector.extract_strided_slice %0 {offsets = [9, 0], sizes = [1, 128], strides = [1, 1]} : vector<16x128xf32> to vector<1x128xf32>
    %145 = vector.extract_strided_slice %0 {offsets = [10, 0], sizes = [1, 128], strides = [1, 1]} : vector<16x128xf32> to vector<1x128xf32>
    %146 = vector.extract_strided_slice %0 {offsets = [11, 0], sizes = [1, 128], strides = [1, 1]} : vector<16x128xf32> to vector<1x128xf32>
    %c3 = arith.constant 3 : index
    %c0_54 = arith.constant 0 : index
    %c0_55 = arith.constant 0 : index
    %147 = vector.load %arg6[%c3, %c0_54, %c0_55] : memref<6x128x128xbf16, #tpu.memory_space<vmem>>, vector<1x128x128xbf16>
    %148 = vector.shape_cast %147 : vector<1x128x128xbf16> to vector<128x128xbf16>
    %c4 = arith.constant 4 : index
    %c0_56 = arith.constant 0 : index
    %c0_57 = arith.constant 0 : index
    %149 = vector.load %arg6[%c4, %c0_56, %c0_57] : memref<6x128x128xbf16, #tpu.memory_space<vmem>>, vector<1x128x128xbf16>
    %150 = vector.shape_cast %149 : vector<1x128x128xbf16> to vector<128x128xbf16>
    %c5 = arith.constant 5 : index
    %c0_58 = arith.constant 0 : index
    %c0_59 = arith.constant 0 : index
    %151 = vector.load %arg6[%c5, %c0_58, %c0_59] : memref<6x128x128xbf16, #tpu.memory_space<vmem>>, vector<1x128x128xbf16>
    %152 = vector.shape_cast %151 : vector<1x128x128xbf16> to vector<128x128xbf16>
    %153 = arith.truncf %142 : vector<8x128xf32> to vector<8x128xbf16>
    %cst_60 = arith.constant dense<0.000000e+00> : vector<8x128xf32>
    %154 = tpu.matmul %153, %148, %cst_60 {dimension_numbers = #tpu.dot_dimension_numbers<[1], [0], [0], [1], [0, 0, 1, 1], [], []>} : vector<8x128xbf16>, vector<128x128xbf16>, vector<8x128xf32> -> vector<8x128xf32>
    %155 = arith.truncf %143 : vector<8x128xf32> to vector<8x128xbf16>
    %cst_61 = arith.constant dense<0.000000e+00> : vector<8x128xf32>
    %156 = tpu.matmul %155, %150, %cst_61 {dimension_numbers = #tpu.dot_dimension_numbers<[1], [0], [0], [1], [0, 0, 1, 1], [], []>} : vector<8x128xbf16>, vector<128x128xbf16>, vector<8x128xf32> -> vector<8x128xf32>
    %157 = arith.addf %154, %156 : vector<8x128xf32>
    %c0_62 = arith.constant 0 : index
    %c0_63 = arith.constant 0 : index
    %158 = vector.load %arg3[%c0_62, %c0_63] : memref<8x1xf32, #tpu.memory_space<vmem>>, vector<8x1xf32>
    %159 = vector.broadcast %158 : vector<8x1xf32> to vector<8x128xf32>
    %160 = vector.broadcast %144 : vector<1x128xf32> to vector<8x128xf32>
    %161 = arith.mulf %159, %160 : vector<8x128xf32>
    %162 = arith.addf %157, %161 : vector<8x128xf32>
    %163 = vector.broadcast %145 : vector<1x128xf32> to vector<8x128xf32>
    %164 = arith.addf %162, %163 : vector<8x128xf32>
    %cst_64 = arith.constant 0.000000e+00 : f32
    %165 = vector.broadcast %cst_64 : f32 to vector<8x128xf32>
    %166 = arith.maximumf %164, %165 : vector<8x128xf32>
    %167 = arith.truncf %166 : vector<8x128xf32> to vector<8x128xbf16>
    %cst_65 = arith.constant dense<0.000000e+00> : vector<8x128xf32>
    %168 = tpu.matmul %167, %152, %cst_65 {dimension_numbers = #tpu.dot_dimension_numbers<[1], [0], [0], [1], [0, 0, 1, 1], [], []>} : vector<8x128xbf16>, vector<128x128xbf16>, vector<8x128xf32> -> vector<8x128xf32>
    %169 = vector.broadcast %146 : vector<1x128xf32> to vector<8x128xf32>
    %170 = arith.addf %168, %169 : vector<8x128xf32>
    %c0_66 = arith.constant 0 : index
    %c0_67 = arith.constant 0 : index
    %171 = vector.load %arg8[%c0_66, %c0_67] : memref<8x128xf32, #tpu.memory_space<vmem>>, vector<8x128xf32>
    tpu.vector_store %arg8[%c0_66, %c0_67], %170 {strides = array<i32>} : memref<8x128xf32, #tpu.memory_space<vmem>>, vector<8x128xf32>,
    return
  }
  func.func @transform_0(%arg0: i32) -> (i32, i32) {
    %c0_i32 = arith.constant 0 : i32
    %c0_i32_0 = arith.constant 0 : i32
    %c0_i32_1 = arith.constant 0 : i32
    return %c0_i32, %c0_i32_0 : i32, i32
  }
  func.func @transform_1(%arg0: i32) -> (i32, i32) {
    %c0_i32 = arith.constant 0 : i32
    %c0_i32_0 = arith.constant 0 : i32
    %c0_i32_1 = arith.constant 0 : i32
    return %c0_i32, %c0_i32_0 : i32, i32
  }
  func.func @transform_2(%arg0: i32) -> (i32, i32) {
    %c0_i32 = arith.constant 0 : i32
    %c0_i32_0 = arith.constant 0 : i32
    %c0_i32_1 = arith.constant 0 : i32
    return %c0_i32, %c0_i32_0 : i32, i32
  }
  func.func @transform_3(%arg0: i32) -> (i32, i32) {
    %c0_i32 = arith.constant 0 : i32
    %c0_i32_0 = arith.constant 0 : i32
    %c0_i32_1 = arith.constant 0 : i32
    return %c0_i32, %c0_i32_0 : i32, i32
  }
  func.func @transform_4(%arg0: i32) -> (i32, i32) {
    %c0_i32 = arith.constant 0 : i32
    %c0_i32_0 = arith.constant 0 : i32
    %c0_i32_1 = arith.constant 0 : i32
    return %c0_i32, %c0_i32_0 : i32, i32
  }
  func.func @transform_5(%arg0: i32) -> (i32, i32, i32) {
    %c0_i32 = arith.constant 0 : i32
    %c0_i32_0 = arith.constant 0 : i32
    %c0_i32_1 = arith.constant 0 : i32
    %c0_i32_2 = arith.constant 0 : i32
    return %c0_i32, %c0_i32_0, %c0_i32_1 : i32, i32, i32
  }
  func.func @transform_6(%arg0: i32) -> (i32, i32) {
    %c0_i32 = arith.constant 0 : i32
    %c0_i32_0 = arith.constant 0 : i32
    %c0_i32_1 = arith.constant 0 : i32
    return %c0_i32, %c0_i32_0 : i32, i32
  }
  func.func @transform_7(%arg0: i32) -> (i32, i32) {
    %c0_i32 = arith.constant 0 : i32
    %c0_i32_0 = arith.constant 0 : i32
    %c0_i32_1 = arith.constant 0 : i32
    return %c0_i32, %c0_i32_0 : i32, i32
  }
}

</mosaic_0001>

<bundles_post_ra>
// kernel: policy_network_forward.1
= control target key start
LH: loop header
LB: loop body
LE: loop exit
PB: predicated region body
PF: predicated region fallthrough
CT: control target
= control target key end

     0   :  { %12 = vsyncpa [#allocation3], 0  ;;  %s3261_s24 = smov [#allocation2]   ;;  %s4225_s0 = inlined_call_operand.vmem [shape: s32[8,1], index: 0, kind: input, shape index: {}]   ;;  %s4226_s1 = inlined_call_operand.vmem [shape: s32[8,1], index: 1, kind: input, shape index: {}]   ;;  %s4227_s2 = inlined_call_operand.vmem [shape: f32[8,1], index: 2, kind: input, shape index: {}]   ;;  %s4228_s3 = inlined_call_operand.vmem [shape: f32[128,128], index: 3, kind: input, shape index: {}]   ;;  %s4229_s4 = inlined_call_operand.vmem [shape: f32[128,128], index: 4, kind: input, shape index: {}]   ;;  %s4230_s5 = inlined_call_operand.hbm [shape: bf16[6,128,128], index: 5, kind: input, shape index: {}]   ;;  %s4231_s6 = inlined_call_operand.vmem [shape: f32[16,128], index: 6, kind: input, shape index: {}]   ;;  %s4232_s7 = inlined_call_operand.vmem [shape: f32[8,128], index: 7, kind: output, shape index: {}]  }
   0x1   :  { %s28_s25 = sshll.u32 %s3261_s24, 4  ;;  %s3237_s28 = scalar_lea.hbm %s4230_s5, 6144  ;;  %s29_s25 = int_to_ptr.vmem [resolvable:$true] %s28_s25 }
   0x2   :  { %p3238_p0 = scmp.ne.s32.totalorder %s4230_s5, %s3237_s28  ;;  %p3241_p1 = scmp.lt.u32.totalorder %s3237_s28, %s4230_s5 }
   0x4   :  { %p3243_p2 = pnand %p3241_p1, %p3238_p0 }
   0x6   :  { %3246 = shalt.err (!%p3243_p2)
}
   0x7   :  { %s3247_s10 = scalar_lea.vmem %s29_s25, 6144  ;;  %p3252_p4 = scmp.lt.s32.totalorder %s29_s25, %s29_s25 }
   0x8   :  { %p3248_p3 = scmp.ne.s32.totalorder %s29_s25, %s3247_s10  ;;  %p3253_p5 = scmp.lt.s32.totalorder %s3247_s10, %s3247_s10 }
   0xa   :  { %p3254_p6 = por %p3253_p5, %p3252_p4 }
   0xc   :  { %p3255_p7 = pnand %p3254_p6, %p3248_p3 }
   0xe   :  { %3258 = shalt.err (!%p3255_p7)
}
   0xf   :  { %s3262_s11 = smov 64   ;;  %s3263_s12 = smov 4  }
  0x10   :  { %34 = dma.hbm_to_vmem [thread:$0]  %s4230_s5, 6144, %s29_s25, [#allocation3], %s3262_s11, %s3262_s11, %s3263_s12  }
  0x11   :  { %3259 = dma.done.wait [#allocation3], 6144  }
  0x12   :  { %3260 = vsyncadd [#allocation3], 4294961152  ;;  %v2995_v0 = vld [vmem:[#allocation2] sm:$0xff]   ;;  %v2996_v1 = vld [vmem:[#allocation2 + $0x8] sm:$0xff]   ;;  %v3264_v32 = vmov 0.0   ;;  %vm4236_vm0 = vmmov 0   ;;  %v277_v33 = vlaneseq }
  0x13   :  { %2634 = vmatprep.subr.bf16.mxu0 %v2995_v0  ;;  %v2997_v2 = vld [vmem:[#allocation2 + $0x10] sm:$0xff]   ;;  %v2998_v3 = vld [vmem:[#allocation2 + $0x18] sm:$0xff]   ;;  %v44_v4 = vld [vmem:[%s4228_s3] sm:$0xff]  ;;  %2666 = vmatprep.subr.bf16.mxu1 %v3264_v32 }
  0x14   :  { %2635 = vmatpush3.bf16.msra.mxu0 %v2995_v0  ;;  %v45_v5 = vld [vmem:[%s4228_s3 + $0x8] sm:$0xff]  ;;  %v2999_v7 = vld [vmem:[#allocation2 + $0x20] sm:$0xff]   ;;  %v3001_v9 = vld [vmem:[#allocation2 + $0x30] sm:$0xff]   ;;  %2682 = vmatprep.mubr.msk.bf16.mxu1 %vm4236_vm0, %v3264_v32  ;;  %v3372_v34 = vshrl.u32 %v277_v33, 7 }
  0x15   :  { %2636 = vmatprep.subr.bf16.mxu0 %v2996_v1  ;;  %v60_v6 = vpack.c.bf16 %v45_v5, %v44_v4  ;;  %v3000_v8 = vld [vmem:[#allocation2 + $0x28] sm:$0xff]   ;;  %v3002_v10 = vld [vmem:[#allocation2 + $0x38] sm:$0xff]   ;;  %v46_v11 = vld [vmem:[%s4228_s3 + $0x10] sm:$0xff] }
  0x16   :  { %v47_v12 = vld [vmem:[%s4228_s3 + $0x18] sm:$0xff]  ;;  %v48_v13 = vld [vmem:[%s4228_s3 + $0x20] sm:$0xff]  ;;  %v49_v14 = vld [vmem:[%s4228_s3 + $0x28] sm:$0xff]  ;;  %v279_v35 = vsub.s32 1, %v3372_v34 }
  0x17   :  { %2650 = vmatprep.mubr.bf16.mxu0 %v60_v6  ;;  %v61_v15 = vpack.c.bf16 %v47_v12, %v46_v11  ;;  %v62_v16 = vpack.c.bf16 %v49_v14, %v48_v13  ;;  %v50_v17 = vld [vmem:[%s4228_s3 + $0x30] sm:$0xff]  ;;  %v51_v18 = vld [vmem:[%s4228_s3 + $0x38] sm:$0xff]  ;;  %v52_v19 = vld [vmem:[%s4228_s3 + $0x40] sm:$0xff] }
  0x18   :  { %2637 = vmatpush3.bf16.msra.mxu0 %v2996_v1  ;;  %v53_v20 = vld [vmem:[%s4228_s3 + $0x48] sm:$0xff]  ;;  %v63_v21 = vpack.c.bf16 %v51_v18, %v50_v17  ;;  %v54_v23 = vld [vmem:[%s4228_s3 + $0x50] sm:$0xff]  ;;  %v55_v24 = vld [vmem:[%s4228_s3 + $0x58] sm:$0xff] }
  0x19   :  { %2638 = vmatprep.subr.bf16.mxu0 %v2997_v2  ;;  %v64_v22 = vpack.c.bf16 %v53_v20, %v52_v19  ;;  %v56_v25 = vld [vmem:[%s4228_s3 + $0x60] sm:$0xff]  ;;  %v57_v26 = vld [vmem:[%s4228_s3 + $0x68] sm:$0xff]  ;;  %v65_v27 = vpack.c.bf16 %v55_v24, %v54_v23  ;;  %v58_v29 = vld [vmem:[%s4228_s3 + $0x70] sm:$0xff]  ;;  %v331_v20 = vsub.s32 0, %v3372_v34 }
  0x1a   :  { %v66_v28 = vpack.c.bf16 %v57_v26, %v56_v25  ;;  %v59_v30 = vld [vmem:[%s4228_s3 + $0x78] sm:$0xff]  ;;  %v3378_v36 = vld [vmem:[%s4231_s6] sm:$0xff]  ;;  %v42_v14 = vld [vmem:[%s4231_s6 + $0x8] sm:$0xff] }
  0x1b   :  { %v67_v31 = vpack.c.bf16 %v59_v30, %v58_v29  ;;  %v3383_v37 = vrot.slane %v3378_v36, %v279_v35  ;;  %v3426_v26 = vld [vmem:[%s4229_s4 + $0x8] sm:$0xff] }
  0x1c   :  { %2639 = vmatpush3.bf16.msra.mxu0 %v2997_v2  ;;  %vm414_vm1 = vcmp.gt.f32.partialorder %v3426_v26, 0.0 }
  0x1d   :  { %2640 = vmatprep.subr.bf16.mxu0 %v2998_v3 }
  0x20   :  { %2641 = vmatpush3.bf16.msra.mxu0 %v2998_v3 }
  0x21   :  { %2642 = vmatprep.subr.bf16.mxu0 %v2999_v7 }
  0x24   :  { %2643 = vmatpush3.bf16.msra.mxu0 %v2999_v7 }
  0x25   :  { %2644 = vmatprep.subr.bf16.mxu0 %v3000_v8 }
  0x28   :  { %2645 = vmatpush3.bf16.msra.mxu0 %v3000_v8 }
  0x29   :  { %2646 = vmatprep.subr.bf16.mxu0 %v3001_v9 }
  0x2c   :  { %2647 = vmatpush3.bf16.msra.mxu0 %v3001_v9 }
  0x2d   :  { %2648 = vmatprep.subr.bf16.mxu0 %v3002_v10 }
  0x30   :  { %2649 = vmatpush3.bf16.msra.mxu0 %v3002_v10 }
  0x33   :  { %2651 = vmatmul.mubr.bf16.vlgmr.msra.gmra.mrb[0].mxu0 %v61_v15  ;;  %v3413_v15 = vpack.c.bf16 %v42_v14, %v3378_v36  ;;  %v3519_v14 = vld [vmem:[%s4229_s4 + $0x40] sm:$0xff] }
  0x34   :  { %2654 = vmatprep.mubr.bf16.mxu0 %v62_v16 }
  0x3b   :  { %2655 = vmatmul.mubr.bf16.gmra.mrb[4].mxu0 %v63_v21 }
  0x3c   :  { %2658 = vmatprep.mubr.bf16.mxu0 %v64_v22 }
  0x43   :  { %2659 = vmatmul.mubr.bf16.gmra.mrb[8].mxu0 %v65_v27  ;;  %v3431_v27 = vld [vmem:[%s4229_s4] sm:$0xff] }
  0x44   :  { %2662 = vmatprep.mubr.bf16.mxu0 %v66_v28  ;;  %vm413_vm2 = vcmp.gt.f32.partialorder %v3431_v27, 0.0 }
  0x4b   :  { %2663 = vmatmul.mubr.bf16.gmra.mrb[12].mxu0 %v67_v31 }
 0x106   :  { %v2652_v38 = vpop.f32.mrb[0].mxu0 }
 0x107   :  { %v166_v39 = vpop.f32.mrb[1].mxu0  ;;  %v283_v40 = vmul.f32 %v2652_v38, %v3383_v37 }
 0x108   :  { %v2653_v41 = vpop.f32.mrb[2].mxu0  ;;  %v281_v42 = vmul.f32 %v3383_v37, %v166_v39 }
 0x109   :  { %v230_v43 = vpack.c.bf16 %v2653_v41, %v2652_v38  ;;  %v169_v44 = vpop.f32.mrb[3].mxu0  ;;  %301 = vadd.xlane.f32.xlu1 %v283_v40  ;;  %v284_v46 = vmul.f32 %v2653_v41, %v3383_v37  ;;  %v3442_v41 = vld [vmem:[%s4229_s4 + $0x18] sm:$0xff] }
 0x10a   :  { %v229_v45 = vpack.c.bf16 %v169_v44, %v166_v39  ;;  %297 = vadd.xlane.f32.xlu0 %v281_v42  ;;  %v282_v47 = vmul.f32 %v3383_v37, %v169_v44  ;;  %v3447_v42 = vld [vmem:[%s4229_s4 + $0x10] sm:$0xff]  ;;  %vm416_vm7 = vcmp.gt.f32.partialorder %v3442_v41, 0.0 }
 0x10b   :  { %vm415_vm8 = vcmp.gt.f32.partialorder %v3447_v42, 0.0 }
 0x10c   :  { %2667 = vmatpush3.bf16.xpose.msra.mxu1 %v229_v45  ;;  %2686 = vmatprep.subr.bf16.mxu0 %v229_v45 }
 0x10d   :  { %2687 = vmatpush3.bf16.msra.mxu0 %v229_v45  ;;  %303 = vadd.xlane.f32.xlu1 %v284_v46 }
 0x10e   :  { %v2656_v48 = vpop.f32.mrb[4].mxu0  ;;  %2688 = vmatprep.subr.bf16.mxu0 %v230_v43  ;;  %299 = vadd.xlane.f32.xlu0 %v282_v47 }
 0x10f   :  { %v182_v49 = vpop.f32.mrb[5].mxu0  ;;  %2668 = vmatprep.subr.bf16.mxu1 %v3264_v32  ;;  %v287_v56 = vmul.f32 %v2656_v48, %v3383_v37 }
 0x110   :  { %v2657_v50 = vpop.f32.mrb[6].mxu0  ;;  %v285_v51 = vmul.f32 %v3383_v37, %v182_v49 }
 0x111   :  { %v232_v52 = vpack.c.bf16 %v2657_v50, %v2656_v48  ;;  %v185_v53 = vpop.f32.mrb[7].mxu0  ;;  %2689 = vmatpush3.bf16.msra.mxu0 %v230_v43  ;;  %v288_v57 = vmul.f32 %v2657_v50, %v3383_v37 }
 0x112   :  { %v231_v54 = vpack.c.bf16 %v185_v53, %v182_v49  ;;  %v286_v55 = vmul.f32 %v3383_v37, %v185_v53  ;;  %305 = vadd.xlane.f32.xlu0 %v285_v51  ;;  %v3456_v51 = vld [vmem:[%s4229_s4 + $0x28] sm:$0xff] }
 0x113   :  { %vm418_vm11 = vcmp.gt.f32.partialorder %v3456_v51, 0.0 }
 0x114   :  { %2669 = vmatpush3.bf16.xpose.msra.mxu1 %v230_v43  ;;  %2690 = vmatprep.subr.bf16.mxu0 %v231_v54 }
 0x115   :  { %2691 = vmatpush3.bf16.msra.mxu0 %v231_v54  ;;  %307 = vadd.xlane.f32.xlu1 %v286_v55 }
 0x116   :  { %2692 = vmatprep.subr.bf16.mxu0 %v232_v52  ;;  %309 = vadd.xlane.f32.xlu0 %v287_v56  ;;  %v2660_v58 = vpop.f32.mrb[8].mxu0 }
 0x117   :  { %2670 = vmatprep.subr.bf16.mxu1 %v3264_v32  ;;  %v198_v59 = vpop.f32.mrb[9].mxu0  ;;  %v291_v2 = vmul.f32 %v2660_v58, %v3383_v37 }
 0x118   :  { %v2661_v60 = vpop.f32.mrb[10].mxu0  ;;  %v289_v61 = vmul.f32 %v3383_v37, %v198_v59 }
 0x119   :  { %2693 = vmatpush3.bf16.msra.mxu0 %v232_v52  ;;  %311 = vadd.xlane.f32.xlu1 %v288_v57  ;;  %v234_v62 = vpack.c.bf16 %v2661_v60, %v2660_v58  ;;  %v201_v63 = vpop.f32.mrb[11].mxu0  ;;  %v292_v3 = vmul.f32 %v2661_v60, %v3383_v37 }
 0x11a   :  { %v233_v0 = vpack.c.bf16 %v201_v63, %v198_v59  ;;  %v290_v1 = vmul.f32 %v3383_v37, %v201_v63  ;;  %313 = vadd.xlane.f32.xlu0 %v289_v61  ;;  %v3482_v63 = vld [vmem:[%s4229_s4 + $0x38] sm:$0xff] }
 0x11b   :  { %vm4233_vm15 = vcmp.gt.f32.partialorder %v3482_v63, 0.0 }
 0x11c   :  { %2671 = vmatpush3.bf16.xpose.msra.mxu1 %v231_v54  ;;  %2694 = vmatprep.subr.bf16.mxu0 %v233_v0 }
 0x11d   :  { %2672 = vmatprep.subr.bf16.mxu1 %v3264_v32  ;;  %2695 = vmatpush3.bf16.msra.mxu0 %v233_v0 }
 0x11e   :  { %315 = vadd.xlane.f32.xlu1 %v290_v1  ;;  %2696 = vmatprep.subr.bf16.mxu0 %v234_v62  ;;  %v2664_v4 = vpop.f32.mrb[12].mxu0 }
 0x11f   :  { %317 = vadd.xlane.f32.xlu0 %v291_v2  ;;  %v214_v5 = vpop.f32.mrb[13].mxu0  ;;  %v295_v12 = vmul.f32 %v2664_v4, %v3383_v37 }
 0x120   :  { %v2665_v6 = vpop.f32.mrb[14].mxu0  ;;  %v293_v7 = vmul.f32 %v3383_v37, %v214_v5 }
 0x121   :  { %2697 = vmatpush3.bf16.msra.mxu0 %v234_v62  ;;  %v236_v8 = vpack.c.bf16 %v2665_v6, %v2664_v4  ;;  %v217_v9 = vpop.f32.mrb[15].mxu0  ;;  %v296_v13 = vmul.f32 %v2665_v6, %v3383_v37 }
 0x122   :  { %319 = vadd.xlane.f32.xlu1 %v292_v3  ;;  %v235_v10 = vpack.c.bf16 %v217_v9, %v214_v5  ;;  %v294_v11 = vmul.f32 %v3383_v37, %v217_v9 }
 0x123   :  { %321 = vadd.xlane.f32.xlu0 %v293_v7 }
 0x124   :  { %2673 = vmatpush3.bf16.xpose.msra.mxu1 %v232_v52  ;;  %2698 = vmatprep.subr.bf16.mxu0 %v235_v10  ;;  %v3461_v52 = vld [vmem:[%s4229_s4 + $0x20] sm:$0xff] }
 0x125   :  { %2674 = vmatprep.subr.bf16.mxu1 %v3264_v32  ;;  %2699 = vmatpush3.bf16.msra.mxu0 %v235_v10  ;;  %vm417_vm12 = vcmp.gt.f32.partialorder %v3461_v52, 0.0 }
 0x126   :  { %323 = vadd.xlane.f32.xlu1 %v294_v11  ;;  %2700 = vmatprep.subr.bf16.mxu0 %v236_v8 }
 0x127   :  { %325 = vadd.xlane.f32.xlu0 %v295_v12 }
 0x129   :  { %2701 = vmatpush3.bf16.msra.mxu0 %v236_v8 }
 0x12a   :  { %327 = vadd.xlane.f32.xlu1 %v296_v13  ;;  %v3514_v13 = vld [vmem:[%s4229_s4 + $0x48] sm:$0xff] }
 0x12c   :  { %2675 = vmatpush3.bf16.xpose.msra.mxu1 %v233_v0  ;;  %v3487_v0 = vld [vmem:[%s4229_s4 + $0x30] sm:$0xff] }
 0x12d   :  { %2676 = vmatprep.subr.bf16.mxu1 %v3264_v32 }
 0x134   :  { %2677 = vmatpush3.bf16.xpose.msra.mxu1 %v234_v62 }
 0x135   :  { %2678 = vmatprep.subr.bf16.mxu1 %v3264_v32 }
 0x13c   :  { %2679 = vmatpush3.bf16.xpose.msra.mxu1 %v235_v10 }
 0x13d   :  { %2680 = vmatprep.subr.bf16.mxu1 %v3264_v32 }
 0x144   :  { %2681 = vmatpush3.bf16.xpose.msra.mxu1 %v236_v8 }
 0x145   :  { %2750 = vmatprep.subr.bf16.mxu1 %v3264_v32 }
 0x14b   :  { %2683 = vmatmul.mubr.bf16.vlgmr.msra.gmra.mrb[0].mxu1 %v3413_v15 }
 0x14c   :  { %2766 = vmatprep.mubr.msk.bf16.mxu1 %vm4236_vm0, %v3264_v32 }
 0x196   :  { %v302_v16 = vpop.xlane.xlu1 %301 }
 0x197   :  { %v298_v17 = vpop.xlane.xlu0 %297 }
 0x19a   :  { %v304_v18 = vpop.xlane.xlu1 %303 }
 0x19b   :  { %v300_v19 = vpop.xlane.xlu0 %299 }
 0x19f   :  { %v306_v22 = vpop.xlane.xlu0 %305 }
 0x1a2   :  { %v308_v21 = vpop.xlane.xlu1 %307 }
 0x1a3   :  { %v310_v40 = vpop.xlane.xlu0 %309 }
 0x1a6   :  { %v312_v39 = vpop.xlane.xlu1 %311 }
 0x1a7   :  { %v314_v54 = vpop.xlane.xlu0 %313 }
 0x1ab   :  { %v316_v53 = vpop.xlane.xlu1 %315 }
 0x1ac   :  { %v318_v10 = vpop.xlane.xlu0 %317 }
 0x1af   :  { %v320_v9 = vpop.xlane.xlu1 %319 }
 0x21e   :  { %v271_v23 = vpop.f32.mrb[0].mxu1 }
 0x21f   :  { %v3421_v24 = vrot.slane %v271_v23, %v331_v20  ;;  %v2684_v25 = vpop.f32.mrb[1].mxu1  ;;  %v324_v23 = vpop.xlane.xlu1 %323 }
 0x220   :  { %v274_v28 = vpop.f32.mrb[2].mxu1  ;;  %v322_v25 = vpop.xlane.xlu0 %321 }
 0x221   :  { %v2685_v29 = vpop.f32.mrb[3].mxu1  ;;  %v334_v30 = vadd.f32 %v3421_v24, %v300_v19  ;;  %v333_v31 = vadd.f32 %v3421_v24, %v298_v17  ;;  %v336_v37 = vadd.f32 %v3421_v24, %v304_v18  ;;  %v335_v38 = vadd.f32 %v3421_v24, %v302_v16  ;;  %v3530_v28 = vld [vmem:[%s4229_s4 + $0x58] sm:$0xff] }
 0x222   :  { %v338_v43 = vadd.f32 %v3421_v24, %v308_v21  ;;  %v337_v44 = vadd.f32 %v3421_v24, %v306_v22  ;;  %v340_v58 = vadd.f32 %v3421_v24, %v312_v39  ;;  %v339_v61 = vadd.f32 %v3421_v24, %v310_v40  ;;  %v3535_v29 = vld [vmem:[%s4229_s4 + $0x50] sm:$0xff] }
 0x223   :  { %vm350_vm3 = vcmp.ge.f32.partialorder %v334_v30, 0.0  ;;  %v366_v45 = vmul.f32 0.2, %v334_v30  ;;  %vm349_vm4 = vcmp.ge.f32.partialorder %v333_v31, 0.0  ;;  %v365_v46 = vmul.f32 0.2, %v333_v31 }
 0x224   :  { %vm352_vm5 = vcmp.ge.f32.partialorder %v336_v37, 0.0  ;;  %v368_v47 = vmul.f32 0.2, %v336_v37  ;;  %vm351_vm6 = vcmp.ge.f32.partialorder %v335_v38, 0.0  ;;  %v367_v48 = vmul.f32 0.2, %v335_v38 }
 0x225   :  { %v382_v49 = vsel %vm350_vm3, %v334_v30, %v366_v45  ;;  %v381_v50 = vsel %vm349_vm4, %v333_v31, %v365_v46  ;;  %v370_v57 = vmul.f32 0.2, %v338_v43  ;;  %vm354_vm9 = vcmp.ge.f32.partialorder %v338_v43, 0.0  ;;  %v328_v45 = vpop.xlane.xlu1 %327  ;;  %v326_v46 = vpop.xlane.xlu0 %325 }
 0x226   :  { %v3465_v55 = vsel %vm414_vm1, %v382_v49, -1e+30  ;;  %v3469_v56 = vsel %vm413_vm2, %v381_v50, -1e+30  ;;  %v384_v59 = vsel %vm352_vm5, %v336_v37, %v368_v47  ;;  %v383_v60 = vsel %vm351_vm6, %v335_v38, %v367_v48 }
 0x227   :  { %447 = vmax.xlane.f32.xlu1 %v3465_v55  ;;  %445 = vmax.xlane.f32.xlu0 %v3469_v56  ;;  %vm353_vm10 = vcmp.ge.f32.partialorder %v337_v44, 0.0  ;;  %v369_v62 = vmul.f32 0.2, %v337_v44  ;;  %v3491_v1 = vsel %vm416_vm7, %v384_v59, -1e+30  ;;  %v386_v3 = vsel %vm354_vm9, %v338_v43, %v370_v57 }
 0x228   :  { %v3495_v2 = vsel %vm415_vm8, %v383_v60, -1e+30  ;;  %v372_v4 = vmul.f32 0.2, %v340_v58  ;;  %v371_v6 = vmul.f32 0.2, %v339_v61  ;;  %v342_v7 = vadd.f32 %v3421_v24, %v316_v53 }
 0x229   :  { %v385_v5 = vsel %vm353_vm10, %v337_v44, %v369_v62  ;;  %v341_v8 = vadd.f32 %v3421_v24, %v314_v54  ;;  %vm356_vm13 = vcmp.ge.f32.partialorder %v340_v58, 0.0  ;;  %vm355_vm14 = vcmp.ge.f32.partialorder %v339_v61, 0.0  ;;  %v3564_v54 = vld [vmem:[%s4229_s4 + $0x68] sm:$0xff] }
 0x22a   :  { %vm419_vm3 = vcmp.gt.f32.partialorder %v3487_v0, 0.0  ;;  %v3505_v11 = vsel %vm418_vm11, %v386_v3, -1e+30  ;;  %v3509_v12 = vsel %vm417_vm12, %v385_v5, -1e+30  ;;  %v344_v16 = vadd.f32 %v3421_v24, %v320_v9 }
 0x22b   :  { %451 = vmax.xlane.f32.xlu1 %v3491_v1  ;;  %449 = vmax.xlane.f32.xlu0 %v3495_v2  ;;  %v343_v17 = vadd.f32 %v3421_v24, %v318_v10  ;;  %v388_v18 = vsel %vm356_vm13, %v340_v58, %v372_v4  ;;  %v387_v19 = vsel %vm355_vm14, %v339_v61, %v371_v6  ;;  %v374_v21 = vmul.f32 0.2, %v342_v7  ;;  %v3569_v58 = vld [vmem:[%s4229_s4 + $0x60] sm:$0xff]  ;;  %v3588_v6 = vld [vmem:[%s4229_s4 + $0x78] sm:$0xff] }
 0x22c   :  { %v373_v22 = vmul.f32 0.2, %v341_v8  ;;  %vm358_vm4 = vcmp.ge.f32.partialorder %v342_v7, 0.0  ;;  %vm357_vm5 = vcmp.ge.f32.partialorder %v341_v8, 0.0  ;;  %vm422_vm6 = vcmp.gt.f32.partialorder %v3514_v13, 0.0 }
 0x22d   :  { %vm4234_vm9 = vcmp.gt.f32.partialorder %v3519_v14, 0.0  ;;  %v346_v30 = vadd.f32 %v3421_v24, %v324_v23  ;;  %v3540_v31 = vsel %vm4233_vm15, %v388_v18, -1e+30  ;;  %v3544_v37 = vsel %vm419_vm3, %v387_v19, -1e+30 }
 0x22e   :  { %v376_v38 = vmul.f32 0.2, %v344_v16  ;;  %v345_v39 = vadd.f32 %v3421_v24, %v322_v25  ;;  %v390_v40 = vsel %vm358_vm4, %v342_v7, %v374_v21  ;;  %v389_v43 = vsel %vm357_vm5, %v341_v8, %v373_v22  ;;  %v3593_v7 = vld [vmem:[%s4229_s4 + $0x70] sm:$0xff] }
 0x22f   :  { %455 = vmax.xlane.f32.xlu1 %v3505_v11  ;;  %453 = vmax.xlane.f32.xlu0 %v3509_v12  ;;  %vm360_vm10 = vcmp.ge.f32.partialorder %v344_v16, 0.0  ;;  %v375_v44 = vmul.f32 0.2, %v343_v17  ;;  %vm359_vm13 = vcmp.ge.f32.partialorder %v343_v17, 0.0  ;;  %vm424_vm14 = vcmp.gt.f32.partialorder %v3530_v28, 0.0 }
 0x230   :  { %vm4235_vm15 = vcmp.gt.f32.partialorder %v3535_v29, 0.0  ;;  %v3553_v47 = vsel %vm422_vm6, %v390_v40, -1e+30  ;;  %v3557_v48 = vsel %vm4234_vm9, %v389_v43, -1e+30  ;;  %v392_v49 = vsel %vm360_vm10, %v344_v16, %v376_v38 }
 0x231   :  { %v378_v50 = vmul.f32 0.2, %v346_v30  ;;  %v391_v53 = vsel %vm359_vm13, %v343_v17, %v375_v44  ;;  %v377_v57 = vmul.f32 0.2, %v345_v39  ;;  %v348_v59 = vadd.f32 %v3421_v24, %v328_v45 }
 0x232   :  { %v347_v60 = vadd.f32 %v3421_v24, %v326_v46  ;;  %vm362_vm4 = vcmp.ge.f32.partialorder %v346_v30, 0.0  ;;  %vm361_vm5 = vcmp.ge.f32.partialorder %v345_v39, 0.0  ;;  %v3575_v61 = vsel %vm424_vm14, %v392_v49, -1e+30 }
 0x233   :  { %459 = vmax.xlane.f32.xlu1 %v3540_v31  ;;  %457 = vmax.xlane.f32.xlu0 %v3544_v37  ;;  %v3579_v62 = vsel %vm4235_vm15, %v391_v53, -1e+30  ;;  %vm426_vm10 = vcmp.gt.f32.partialorder %v3564_v54, 0.0  ;;  %vm4240_vm13 = vcmp.gt.f32.partialorder %v3569_v58, 0.0  ;;  %v394_v3 = vsel %vm362_vm4, %v346_v30, %v378_v50 }
 0x234   :  { %v393_v24 = vsel %vm361_vm5, %v345_v39, %v377_v57  ;;  %v380_v4 = vmul.f32 0.2, %v348_v59  ;;  %v379_v5 = vmul.f32 0.2, %v347_v60  ;;  %vm364_vm9 = vcmp.ge.f32.partialorder %v348_v59, 0.0 }
 0x235   :  { %vm363_vm15 = vcmp.ge.f32.partialorder %v347_v60, 0.0  ;;  %v3597_v8 = vsel %vm426_vm10, %v394_v3, -1e+30  ;;  %v3601_v9 = vsel %vm4240_vm13, %v393_v24, -1e+30  ;;  %vm4239_vm4 = vcmp.gt.f32.partialorder %v3588_v6, 0.0 }
 0x236   :  { %v396_v10 = vsel %vm364_vm9, %v348_v59, %v380_v4  ;;  %v395_v16 = vsel %vm363_vm15, %v347_v60, %v379_v5  ;;  %vm4238_vm5 = vcmp.gt.f32.partialorder %v3593_v7, 0.0 }
 0x237   :  { %463 = vmax.xlane.f32.xlu1 %v3553_v47  ;;  %461 = vmax.xlane.f32.xlu0 %v3557_v48  ;;  %v3609_v17 = vsel %vm4239_vm4, %v396_v10, -1e+30  ;;  %v3613_v18 = vsel %vm4238_vm5, %v395_v16, -1e+30 }
 0x23b   :  { %467 = vmax.xlane.f32.xlu1 %v3575_v61  ;;  %465 = vmax.xlane.f32.xlu0 %v3579_v62 }
 0x23f   :  { %471 = vmax.xlane.f32.xlu1 %v3597_v8  ;;  %469 = vmax.xlane.f32.xlu0 %v3601_v9 }
 0x243   :  { %475 = vmax.xlane.f32.xlu1 %v3609_v17  ;;  %473 = vmax.xlane.f32.xlu0 %v3613_v18 }
 0x2b4   :  { %v448_v19 = vpop.xlane.xlu1 %447  ;;  %v446_v21 = vpop.xlane.xlu0 %445 }
 0x2b5   :  { %v478_v22 = vsub.f32 %v3465_v55, %v448_v19  ;;  %v477_v23 = vsub.f32 %v3469_v56, %v446_v21 }
 0x2b7   :  { %v495_v25 = vmul.f32 1.442695, %v478_v22  ;;  %v493_v30 = vmul.f32 1.442695, %v477_v23 }
 0x2b8   :  { %v452_v38 = vpop.xlane.xlu1 %451  ;;  %v450_v39 = vpop.xlane.xlu0 %449 }
 0x2b9   :  { %3043 = vpow2.f32 %v495_v25  ;;  %v480_v40 = vsub.f32 %v3491_v1, %v452_v38  ;;  %v479_v43 = vsub.f32 %v3495_v2, %v450_v39 }
 0x2ba   :  { %3045 = vpow2.f32 %v493_v30 }
 0x2bb   :  { %v499_v44 = vmul.f32 1.442695, %v480_v40  ;;  %v497_v45 = vmul.f32 1.442695, %v479_v43 }
 0x2bc   :  { %v456_v46 = vpop.xlane.xlu1 %455  ;;  %v454_v49 = vpop.xlane.xlu0 %453 }
 0x2bd   :  { %3047 = vpow2.f32 %v499_v44  ;;  %v482_v50 = vsub.f32 %v3505_v11, %v456_v46  ;;  %v481_v55 = vsub.f32 %v3509_v12, %v454_v49 }
 0x2be   :  { %3049 = vpow2.f32 %v497_v45 }
 0x2bf   :  { %v503_v56 = vmul.f32 1.442695, %v482_v50  ;;  %v501_v53 = vmul.f32 1.442695, %v481_v55 }
 0x2c0   :  { %v460_v57 = vpop.xlane.xlu1 %459  ;;  %v458_v59 = vpop.xlane.xlu0 %457 }
 0x2c1   :  { %3051 = vpow2.f32 %v503_v56  ;;  %v484_v1 = vsub.f32 %v3540_v31, %v460_v57  ;;  %v483_v2 = vsub.f32 %v3544_v37, %v458_v59 }
 0x2c2   :  { %3053 = vpow2.f32 %v501_v53 }
 0x2c3   :  { %v3625_v60 = vpop.eup %3043  ;;  %v507_v3 = vmul.f32 1.442695, %v484_v1  ;;  %v505_v24 = vmul.f32 1.442695, %v483_v2 }
 0x2c4   :  { %v3627_v4 = vpop.eup %3045  ;;  %527 = vadd.xlane.f32.xlu1 %v3625_v60  ;;  %v464_v11 = vpop.xlane.xlu1 %463 }
 0x2c5   :  { %v462_v12 = vpop.xlane.xlu0 %461  ;;  %3055 = vpow2.f32 %v507_v3  ;;  %v486_v5 = vsub.f32 %v3553_v47, %v464_v11  ;;  %525 = vadd.xlane.f32.xlu0 %v3627_v4 }
 0x2c6   :  { %v485_v31 = vsub.f32 %v3557_v48, %v462_v12  ;;  %3057 = vpow2.f32 %v505_v24  ;;  %v3003_v24 = vld [vmem:[#allocation2 + $0x40] sm:$0xff]  }
 0x2c7   :  { %v3633_v37 = vpop.eup %3047  ;;  %v511_v10 = vmul.f32 1.442695, %v486_v5  ;;  %2718 = vmatprep.subr.bf16.mxu0 %v3003_v24 }
 0x2c8   :  { %v509_v16 = vmul.f32 1.442695, %v485_v31  ;;  %v3635_v19 = vpop.eup %3049  ;;  %531 = vadd.xlane.f32.xlu1 %v3633_v37  ;;  %v468_v21 = vpop.xlane.xlu1 %467 }
 0x2c9   :  { %v466_v22 = vpop.xlane.xlu0 %465  ;;  %3059 = vpow2.f32 %v511_v10  ;;  %v488_v23 = vsub.f32 %v3575_v61, %v468_v21  ;;  %529 = vadd.xlane.f32.xlu0 %v3635_v19 }
 0x2ca   :  { %v487_v47 = vsub.f32 %v3579_v62, %v466_v22  ;;  %3061 = vpow2.f32 %v509_v16 }
 0x2cb   :  { %v3641_v48 = vpop.eup %3051  ;;  %v515_v25 = vmul.f32 1.442695, %v488_v23 }
 0x2cc   :  { %v513_v30 = vmul.f32 1.442695, %v487_v47  ;;  %v3643_v38 = vpop.eup %3053  ;;  %535 = vadd.xlane.f32.xlu1 %v3641_v48  ;;  %v472_v39 = vpop.xlane.xlu1 %471 }
 0x2cd   :  { %v470_v40 = vpop.xlane.xlu0 %469  ;;  %3063 = vpow2.f32 %v515_v25  ;;  %v490_v43 = vsub.f32 %v3597_v8, %v472_v39  ;;  %533 = vadd.xlane.f32.xlu0 %v3643_v38 }
 0x2ce   :  { %v489_v61 = vsub.f32 %v3601_v9, %v470_v40  ;;  %3065 = vpow2.f32 %v513_v30 }
 0x2cf   :  { %v3649_v62 = vpop.eup %3055  ;;  %v519_v44 = vmul.f32 1.442695, %v490_v43 }
 0x2d0   :  { %v517_v45 = vmul.f32 1.442695, %v489_v61  ;;  %v3651_v46 = vpop.eup %3057  ;;  %539 = vadd.xlane.f32.xlu1 %v3649_v62  ;;  %v476_v49 = vpop.xlane.xlu1 %475 }
 0x2d1   :  { %v474_v50 = vpop.xlane.xlu0 %473  ;;  %3067 = vpow2.f32 %v519_v44  ;;  %v492_v55 = vsub.f32 %v3609_v17, %v476_v49  ;;  %537 = vadd.xlane.f32.xlu0 %v3651_v46 }
 0x2d2   :  { %v491_v8 = vsub.f32 %v3613_v18, %v474_v50  ;;  %3069 = vpow2.f32 %v517_v45 }
 0x2d3   :  { %v3657_v9 = vpop.eup %3059  ;;  %v523_v56 = vmul.f32 1.442695, %v492_v55 }
 0x2d4   :  { %v521_v53 = vmul.f32 1.442695, %v491_v8  ;;  %v3659_v57 = vpop.eup %3061  ;;  %543 = vadd.xlane.f32.xlu1 %v3657_v9 }
 0x2d5   :  { %3071 = vpow2.f32 %v523_v56  ;;  %541 = vadd.xlane.f32.xlu0 %v3659_v57 }
 0x2d6   :  { %3073 = vpow2.f32 %v521_v53 }
 0x2d7   :  { %v3663_v59 = vpop.eup %3063 }
 0x2d8   :  { %v3665_v17 = vpop.eup %3065  ;;  %547 = vadd.xlane.f32.xlu1 %v3663_v59 }
 0x2d9   :  { %545 = vadd.xlane.f32.xlu0 %v3665_v17 }
 0x2db   :  { %v3669_v18 = vpop.eup %3067 }
 0x2dc   :  { %v3671_v1 = vpop.eup %3069  ;;  %551 = vadd.xlane.f32.xlu1 %v3669_v18 }
 0x2dd   :  { %549 = vadd.xlane.f32.xlu0 %v3671_v1 }
 0x2df   :  { %v3675_v2 = vpop.eup %3071 }
 0x2e0   :  { %v3677_v3 = vpop.eup %3073  ;;  %555 = vadd.xlane.f32.xlu1 %v3675_v2 }
 0x2e1   :  { %553 = vadd.xlane.f32.xlu0 %v3677_v3 }
 0x351   :  { %v528_v11 = vpop.xlane.xlu1 %527 }
 0x352   :  { %3075 = vrcp.f32 %v528_v11  ;;  %v526_v12 = vpop.xlane.xlu0 %525 }
 0x353   :  { %3077 = vrcp.f32 %v526_v12  ;;  %v3005_v12 = vld [vmem:[#allocation2 + $0x50] sm:$0xff]  }
 0x355   :  { %v532_v5 = vpop.xlane.xlu1 %531 }
 0x356   :  { %3079 = vrcp.f32 %v532_v5  ;;  %v530_v31 = vpop.xlane.xlu0 %529 }
 0x357   :  { %3081 = vrcp.f32 %v530_v31 }
 0x359   :  { %v536_v10 = vpop.xlane.xlu1 %535 }
 0x35a   :  { %3083 = vrcp.f32 %v536_v10  ;;  %v534_v16 = vpop.xlane.xlu0 %533 }
 0x35b   :  { %3085 = vrcp.f32 %v534_v16 }
 0x35c   :  { %v3076_v21 = vpop.eup %3075 }
 0x35d   :  { %v3078_v22 = vpop.eup %3077  ;;  %v540_v23 = vpop.xlane.xlu1 %539  ;;  %v560_v47 = vmul.f32 %v3076_v21, %v3625_v60  ;;  %v3004_v60 = vld [vmem:[#allocation2 + $0x48] sm:$0xff]  }
 0x35e   :  { %3087 = vrcp.f32 %v540_v23  ;;  %v538_v25 = vpop.xlane.xlu0 %537  ;;  %v558_v30 = vmul.f32 %v3078_v22, %v3627_v4 }
 0x35f   :  { %3089 = vrcp.f32 %v538_v25 }
 0x360   :  { %v3080_v39 = vpop.eup %3079  ;;  %v589_v40 = vpack.c.bf16 %v560_v47, %v558_v30 }
 0x361   :  { %v3082_v43 = vpop.eup %3081  ;;  %v564_v61 = vmul.f32 %v3080_v39, %v3633_v37  ;;  %v544_v44 = vpop.xlane.xlu1 %543 }
 0x362   :  { %v562_v45 = vmul.f32 %v3082_v43, %v3635_v19  ;;  %3091 = vrcp.f32 %v544_v44  ;;  %2702 = vmatprep.mubr.bf16.mxu0 %v589_v40  ;;  %v542_v49 = vpop.xlane.xlu0 %541 }
 0x363   :  { %3093 = vrcp.f32 %v542_v49 }
 0x364   :  { %v3084_v50 = vpop.eup %3083  ;;  %v590_v55 = vpack.c.bf16 %v564_v61, %v562_v45  ;;  %v3008_v45 = vld [vmem:[#allocation2 + $0x68] sm:$0xff]  }
 0x365   :  { %v3086_v8 = vpop.eup %3085  ;;  %v548_v56 = vpop.xlane.xlu1 %547  ;;  %v568_v4 = vmul.f32 %v3084_v50, %v3641_v48 }
 0x366   :  { %3095 = vrcp.f32 %v548_v56  ;;  %2703 = vmatmul.mubr.bf16.vlgmr.msra.gmra.mrb[16].mxu0 %v590_v55  ;;  %v546_v53 = vpop.xlane.xlu0 %545  ;;  %v566_v11 = vmul.f32 %v3086_v8, %v3643_v38  ;;  %v3006_v38 = vld [vmem:[#allocation2 + $0x58] sm:$0xff]  }
 0x367   :  { %3097 = vrcp.f32 %v546_v53  ;;  %2719 = vmatpush3.bf16.msra.mxu0 %v3003_v24  ;;  %v3010_v53 = vld [vmem:[#allocation2 + $0x78] sm:$0xff]  }
 0x368   :  { %v3088_v37 = vpop.eup %3087  ;;  %v591_v19 = vpack.c.bf16 %v568_v4, %v566_v11  ;;  %2720 = vmatprep.subr.bf16.mxu0 %v3004_v60  ;;  %v3009_v4 = vld [vmem:[#allocation2 + $0x70] sm:$0xff]  }
 0x369   :  { %v3090_v5 = vpop.eup %3089  ;;  %v552_v31 = vpop.xlane.xlu1 %551  ;;  %v572_v10 = vmul.f32 %v3088_v37, %v3649_v62 }
 0x36a   :  { %3099 = vrcp.f32 %v552_v31  ;;  %2706 = vmatprep.mubr.bf16.mxu0 %v591_v19  ;;  %v550_v16 = vpop.xlane.xlu0 %549  ;;  %v570_v48 = vmul.f32 %v3090_v5, %v3651_v46  ;;  %v3007_v46 = vld [vmem:[#allocation2 + $0x60] sm:$0xff]  }
 0x36b   :  { %3101 = vrcp.f32 %v550_v16  ;;  %2721 = vmatpush3.bf16.msra.mxu0 %v3004_v60 }
 0x36c   :  { %v3092_v21 = vpop.eup %3091  ;;  %v592_v22 = vpack.c.bf16 %v572_v10, %v570_v48  ;;  %2722 = vmatprep.subr.bf16.mxu0 %v3005_v12 }
 0x36d   :  { %v3094_v24 = vpop.eup %3093  ;;  %v556_v23 = vpop.xlane.xlu1 %555  ;;  %v576_v47 = vmul.f32 %v3092_v21, %v3657_v9 }
 0x36e   :  { %3103 = vrcp.f32 %v556_v23  ;;  %2707 = vmatmul.mubr.bf16.gmra.mrb[20].mxu0 %v592_v22  ;;  %v554_v25 = vpop.xlane.xlu0 %553  ;;  %v574_v62 = vmul.f32 %v3094_v24, %v3659_v57 }
 0x36f   :  { %3105 = vrcp.f32 %v554_v25  ;;  %2723 = vmatpush3.bf16.msra.mxu0 %v3005_v12 }
 0x370   :  { %v3096_v30 = vpop.eup %3095  ;;  %v593_v39 = vpack.c.bf16 %v576_v47, %v574_v62  ;;  %2724 = vmatprep.subr.bf16.mxu0 %v3006_v38 }
 0x371   :  { %v3098_v40 = vpop.eup %3097  ;;  %v580_v43 = vmul.f32 %v3096_v30, %v3663_v59 }
 0x372   :  { %2710 = vmatprep.mubr.bf16.mxu0 %v593_v39  ;;  %v578_v61 = vmul.f32 %v3098_v40, %v3665_v17 }
 0x373   :  { %2725 = vmatpush3.bf16.msra.mxu0 %v3006_v38 }
 0x374   :  { %v3100_v44 = vpop.eup %3099  ;;  %v594_v9 = vpack.c.bf16 %v580_v43, %v578_v61  ;;  %2726 = vmatprep.subr.bf16.mxu0 %v3007_v46 }
 0x375   :  { %v3102_v49 = vpop.eup %3101  ;;  %v584_v57 = vmul.f32 %v3100_v44, %v3669_v18  ;;  %v599_v18 = vsub.s32 2, %v3372_v34 }
 0x376   :  { %2711 = vmatmul.mubr.bf16.gmra.mrb[24].mxu0 %v594_v9  ;;  %v582_v50 = vmul.f32 %v3102_v49, %v3671_v1 }
 0x377   :  { %2727 = vmatpush3.bf16.msra.mxu0 %v3007_v46  ;;  %v600_v1 = vrot.slane %v3378_v36, %v599_v18 }
 0x378   :  { %v3104_v55 = vpop.eup %3103  ;;  %v595_v60 = vpack.c.bf16 %v584_v57, %v582_v50  ;;  %2728 = vmatprep.subr.bf16.mxu0 %v3008_v45 }
 0x379   :  { %v3106_v8 = vpop.eup %3105  ;;  %v588_v59 = vmul.f32 %v3104_v55, %v3675_v2 }
 0x37a   :  { %2714 = vmatprep.mubr.bf16.mxu0 %v595_v60  ;;  %v586_v17 = vmul.f32 %v3106_v8, %v3677_v3 }
 0x37b   :  { %2729 = vmatpush3.bf16.msra.mxu0 %v3008_v45 }
 0x37c   :  { %v596_v56 = vpack.c.bf16 %v588_v59, %v586_v17  ;;  %2730 = vmatprep.subr.bf16.mxu0 %v3009_v4 }
 0x37e   :  { %2715 = vmatmul.mubr.bf16.gmra.mrb[28].mxu0 %v596_v56 }
 0x37f   :  { %2731 = vmatpush3.bf16.msra.mxu0 %v3009_v4 }
 0x380   :  { %2732 = vmatprep.subr.bf16.mxu0 %v3010_v53 }
 0x383   :  { %2733 = vmatpush3.bf16.msra.mxu0 %v3010_v53 }
 0x439   :  { %v2704_v11 = vpop.f32.mrb[16].mxu0 }
 0x43a   :  { %v644_v2 = vadd.f32 %v2704_v11, %v600_v1  ;;  %v635_v37 = vpop.f32.mrb[17].mxu0 }
 0x43b   :  { %v636_v19 = vadd.f32 %v635_v37, %v600_v1  ;;  %v2705_v3 = vpop.f32.mrb[18].mxu0 }
 0x43c   :  { %v647_v12 = vadd.f32 %v2705_v3, %v600_v1  ;;  %v638_v5 = vpop.f32.mrb[19].mxu0  ;;  %v700_v10 = vmax.f32 %v644_v2, 0.0 }
 0x43d   :  { %v639_v31 = vadd.f32 %v638_v5, %v600_v1  ;;  %v698_v48 = vmax.f32 %v636_v19, 0.0 }
 0x43e   :  { %v701_v16 = vmax.f32 %v647_v12, 0.0 }
 0x43f   :  { %v699_v21 = vmax.f32 %v639_v31, 0.0 }
 0x440   :  { %v715_v22 = vpack.c.bf16 %v701_v16, %v700_v10 }
 0x441   :  { %v714_v38 = vpack.c.bf16 %v699_v21, %v698_v48  ;;  %v2708_v24 = vpop.f32.mrb[20].mxu0 }
 0x442   :  { %v660_v23 = vadd.f32 %v2708_v24, %v600_v1  ;;  %v651_v47 = vpop.f32.mrb[21].mxu0 }
 0x443   :  { %v652_v25 = vadd.f32 %v651_v47, %v600_v1  ;;  %v2709_v62 = vpop.f32.mrb[22].mxu0  ;;  %2734 = vmatprep.mubr.bf16.mxu0 %v714_v38 }
 0x444   :  { %v663_v30 = vadd.f32 %v2709_v62, %v600_v1  ;;  %v654_v39 = vpop.f32.mrb[23].mxu0  ;;  %2735 = vmatmul.mubr.bf16.vlgmr.msra.gmra.mrb[32].mxu0 %v715_v22  ;;  %v704_v40 = vmax.f32 %v660_v23, 0.0 }
 0x445   :  { %v655_v46 = vadd.f32 %v654_v39, %v600_v1  ;;  %v702_v61 = vmax.f32 %v652_v25, 0.0  ;;  %v934_v25 = vsub.s32 4, %v3372_v34 }
 0x446   :  { %v705_v43 = vmax.f32 %v663_v30, 0.0 }
 0x447   :  { %v703_v44 = vmax.f32 %v655_v46, 0.0  ;;  %v3703_v62 = vrot.slane %v3378_v36, %v934_v25 }
 0x448   :  { %v717_v9 = vpack.c.bf16 %v705_v43, %v704_v40 }
 0x449   :  { %v716_v45 = vpack.c.bf16 %v703_v44, %v702_v61  ;;  %v2712_v49 = vpop.f32.mrb[24].mxu0 }
 0x44a   :  { %v676_v57 = vadd.f32 %v2712_v49, %v600_v1  ;;  %v667_v50 = vpop.f32.mrb[25].mxu0 }
 0x44b   :  { %v668_v55 = vadd.f32 %v667_v50, %v600_v1  ;;  %v2713_v60 = vpop.f32.mrb[26].mxu0  ;;  %2738 = vmatprep.mubr.bf16.mxu0 %v716_v45 }
 0x44c   :  { %v679_v8 = vadd.f32 %v2713_v60, %v600_v1  ;;  %v670_v59 = vpop.f32.mrb[27].mxu0  ;;  %2739 = vmatmul.mubr.bf16.gmra.mrb[36].mxu0 %v717_v9  ;;  %v708_v56 = vmax.f32 %v676_v57, 0.0 }
 0x44d   :  { %v671_v17 = vadd.f32 %v670_v59, %v600_v1  ;;  %v706_v53 = vmax.f32 %v668_v55, 0.0 }
 0x44e   :  { %v709_v4 = vmax.f32 %v679_v8, 0.0 }
 0x44f   :  { %v707_v11 = vmax.f32 %v671_v17, 0.0 }
 0x450   :  { %v719_v2 = vpack.c.bf16 %v709_v4, %v708_v56 }
 0x451   :  { %v718_v37 = vpack.c.bf16 %v707_v11, %v706_v53  ;;  %v2716_v19 = vpop.f32.mrb[28].mxu0 }
 0x452   :  { %v692_v3 = vadd.f32 %v2716_v19, %v600_v1  ;;  %v683_v12 = vpop.f32.mrb[29].mxu0 }
 0x453   :  { %v684_v5 = vadd.f32 %v683_v12, %v600_v1  ;;  %v2717_v31 = vpop.f32.mrb[30].mxu0  ;;  %2742 = vmatprep.mubr.bf16.mxu0 %v718_v37 }
 0x454   :  { %v695_v10 = vadd.f32 %v2717_v31, %v600_v1  ;;  %v686_v16 = vpop.f32.mrb[31].mxu0  ;;  %2743 = vmatmul.mubr.bf16.gmra.mrb[40].mxu0 %v719_v2  ;;  %v712_v21 = vmax.f32 %v692_v3, 0.0 }
 0x455   :  { %v687_v48 = vadd.f32 %v686_v16, %v600_v1  ;;  %v710_v38 = vmax.f32 %v684_v5, 0.0 }
 0x456   :  { %v713_v22 = vmax.f32 %v695_v10, 0.0 }
 0x457   :  { %v711_v24 = vmax.f32 %v687_v48, 0.0 }
 0x458   :  { %v721_v23 = vpack.c.bf16 %v713_v22, %v712_v21 }
 0x459   :  { %v720_v47 = vpack.c.bf16 %v711_v24, %v710_v38 }
 0x45b   :  { %2746 = vmatprep.mubr.bf16.mxu0 %v720_v47 }
 0x45c   :  { %2747 = vmatmul.mubr.bf16.gmra.mrb[44].mxu0 %v721_v23 }
 0x517   :  { %v2736_v30 = vpop.f32.mrb[32].mxu0 }
 0x518   :  { %v821_v39 = vpop.f32.mrb[33].mxu0  ;;  %v938_v9 = vmul.f32 %v2736_v30, %v3703_v62 }
 0x519   :  { %v2737_v46 = vpop.f32.mrb[34].mxu0  ;;  %v936_v40 = vmul.f32 %v3703_v62, %v821_v39 }
 0x51a   :  { %v885_v43 = vpack.c.bf16 %v2737_v46, %v2736_v30  ;;  %v824_v1 = vpop.f32.mrb[35].mxu0  ;;  %v939_v45 = vmul.f32 %v2737_v46, %v3703_v62 }
 0x51b   :  { %v884_v61 = vpack.c.bf16 %v824_v1, %v821_v39  ;;  %952 = vadd.xlane.f32.xlu0 %v936_v40  ;;  %v937_v44 = vmul.f32 %v3703_v62, %v824_v1  ;;  %v986_v1 = vsub.s32 3, %v3372_v34 }
 0x51d   :  { %954 = vadd.xlane.f32.xlu1 %v937_v44  ;;  %2751 = vmatpush3.bf16.xpose.msra.mxu1 %v884_v61 }
 0x51e   :  { %2770 = vmatprep.subr.bf16.mxu0 %v884_v61  ;;  %2752 = vmatprep.subr.bf16.mxu1 %v3264_v32 }
 0x51f   :  { %2771 = vmatpush3.bf16.msra.mxu0 %v884_v61  ;;  %956 = vadd.xlane.f32.xlu0 %v938_v9  ;;  %v2740_v36 = vpop.f32.mrb[36].mxu0 }
 0x520   :  { %2772 = vmatprep.subr.bf16.mxu0 %v885_v43  ;;  %v837_v49 = vpop.f32.mrb[37].mxu0  ;;  %v942_v17 = vmul.f32 %v2740_v36, %v3703_v62 }
 0x521   :  { %958 = vadd.xlane.f32.xlu1 %v939_v45  ;;  %v2741_v57 = vpop.f32.mrb[38].mxu0  ;;  %v940_v50 = vmul.f32 %v3703_v62, %v837_v49 }
 0x522   :  { %v887_v55 = vpack.c.bf16 %v2741_v57, %v2740_v36  ;;  %v840_v60 = vpop.f32.mrb[39].mxu0  ;;  %v943_v4 = vmul.f32 %v2741_v57, %v3703_v62 }
 0x523   :  { %v886_v8 = vpack.c.bf16 %v840_v60, %v837_v49  ;;  %2773 = vmatpush3.bf16.msra.mxu0 %v885_v43  ;;  %960 = vadd.xlane.f32.xlu0 %v940_v50  ;;  %v941_v59 = vmul.f32 %v3703_v62, %v840_v60 }
 0x525   :  { %2753 = vmatpush3.bf16.xpose.msra.mxu1 %v885_v43  ;;  %962 = vadd.xlane.f32.xlu1 %v941_v59 }
 0x526   :  { %2774 = vmatprep.subr.bf16.mxu0 %v886_v8  ;;  %2754 = vmatprep.subr.bf16.mxu1 %v3264_v32 }
 0x527   :  { %2775 = vmatpush3.bf16.msra.mxu0 %v886_v8  ;;  %964 = vadd.xlane.f32.xlu0 %v942_v17  ;;  %v2744_v56 = vpop.f32.mrb[40].mxu0 }
 0x528   :  { %2776 = vmatprep.subr.bf16.mxu0 %v887_v55  ;;  %v853_v53 = vpop.f32.mrb[41].mxu0  ;;  %v946_v5 = vmul.f32 %v2744_v56, %v3703_v62 }
 0x529   :  { %966 = vadd.xlane.f32.xlu1 %v943_v4  ;;  %v2745_v11 = vpop.f32.mrb[42].mxu0  ;;  %v944_v2 = vmul.f32 %v3703_v62, %v853_v53 }
 0x52a   :  { %v889_v37 = vpack.c.bf16 %v2745_v11, %v2744_v56  ;;  %v856_v19 = vpop.f32.mrb[43].mxu0  ;;  %v947_v10 = vmul.f32 %v2745_v11, %v3703_v62 }
 0x52b   :  { %v888_v3 = vpack.c.bf16 %v856_v19, %v853_v53  ;;  %2777 = vmatpush3.bf16.msra.mxu0 %v887_v55  ;;  %968 = vadd.xlane.f32.xlu0 %v944_v2  ;;  %v945_v12 = vmul.f32 %v3703_v62, %v856_v19 }
 0x52d   :  { %2755 = vmatpush3.bf16.xpose.msra.mxu1 %v886_v8  ;;  %970 = vadd.xlane.f32.xlu1 %v945_v12 }
 0x52e   :  { %2778 = vmatprep.subr.bf16.mxu0 %v888_v3  ;;  %2756 = vmatprep.subr.bf16.mxu1 %v3264_v32 }
 0x52f   :  { %2779 = vmatpush3.bf16.msra.mxu0 %v888_v3  ;;  %972 = vadd.xlane.f32.xlu0 %v946_v5  ;;  %v2748_v31 = vpop.f32.mrb[44].mxu0 }
 0x530   :  { %2780 = vmatprep.subr.bf16.mxu0 %v889_v37  ;;  %v869_v16 = vpop.f32.mrb[45].mxu0  ;;  %v950_v47 = vmul.f32 %v2748_v31, %v3703_v62 }
 0x531   :  { %974 = vadd.xlane.f32.xlu1 %v947_v10  ;;  %v2749_v48 = vpop.f32.mrb[46].mxu0  ;;  %v948_v21 = vmul.f32 %v3703_v62, %v869_v16 }
 0x532   :  { %v891_v22 = vpack.c.bf16 %v2749_v48, %v2748_v31  ;;  %v872_v38 = vpop.f32.mrb[47].mxu0  ;;  %v951_v25 = vmul.f32 %v2749_v48, %v3703_v62 }
 0x533   :  { %v890_v24 = vpack.c.bf16 %v872_v38, %v869_v16  ;;  %2781 = vmatpush3.bf16.msra.mxu0 %v889_v37  ;;  %976 = vadd.xlane.f32.xlu0 %v948_v21  ;;  %v949_v23 = vmul.f32 %v3703_v62, %v872_v38 }
 0x535   :  { %2757 = vmatpush3.bf16.xpose.msra.mxu1 %v887_v55  ;;  %978 = vadd.xlane.f32.xlu1 %v949_v23 }
 0x536   :  { %2782 = vmatprep.subr.bf16.mxu0 %v890_v24  ;;  %2758 = vmatprep.subr.bf16.mxu1 %v3264_v32 }
 0x537   :  { %2783 = vmatpush3.bf16.msra.mxu0 %v890_v24  ;;  %980 = vadd.xlane.f32.xlu0 %v950_v47 }
 0x538   :  { %2784 = vmatprep.subr.bf16.mxu0 %v891_v22 }
 0x539   :  { %982 = vadd.xlane.f32.xlu1 %v951_v25 }
 0x53b   :  { %2785 = vmatpush3.bf16.msra.mxu0 %v891_v22 }
 0x53d   :  { %2759 = vmatpush3.bf16.xpose.msra.mxu1 %v888_v3 }
 0x53e   :  { %2760 = vmatprep.subr.bf16.mxu1 %v3264_v32 }
 0x545   :  { %2761 = vmatpush3.bf16.xpose.msra.mxu1 %v889_v37 }
 0x546   :  { %2762 = vmatprep.subr.bf16.mxu1 %v3264_v32 }
 0x54d   :  { %2763 = vmatpush3.bf16.xpose.msra.mxu1 %v890_v24 }
 0x54e   :  { %2764 = vmatprep.subr.bf16.mxu1 %v3264_v32 }
 0x555   :  { %2765 = vmatpush3.bf16.xpose.msra.mxu1 %v891_v22 }
 0x556   :  { %2834 = vmatprep.subr.bf16.mxu1 %v3264_v32 }
 0x55c   :  { %2767 = vmatmul.mubr.bf16.vlgmr.msra.gmra.mrb[4].mxu1 %v3413_v15 }
 0x55d   :  { %2850 = vmatprep.mubr.msk.bf16.mxu1 %vm4236_vm0, %v3264_v32 }
 0x5a8   :  { %v953_v62 = vpop.xlane.xlu0 %952 }
 0x5aa   :  { %v955_v30 = vpop.xlane.xlu1 %954 }
 0x5ac   :  { %v957_v39 = vpop.xlane.xlu0 %956 }
 0x5ae   :  { %v959_v46 = vpop.xlane.xlu1 %958 }
 0x5b0   :  { %v961_v40 = vpop.xlane.xlu0 %960 }
 0x5b2   :  { %v963_v43 = vpop.xlane.xlu1 %962 }
 0x5b4   :  { %v965_v61 = vpop.xlane.xlu0 %964 }
 0x5b6   :  { %v967_v44 = vpop.xlane.xlu1 %966 }
 0x5b8   :  { %v969_v53 = vpop.xlane.xlu0 %968 }
 0x5ba   :  { %v971_v11 = vpop.xlane.xlu1 %970 }
 0x5bc   :  { %v973_v38 = vpop.xlane.xlu0 %972 }
 0x5be   :  { %v975_v24 = vpop.xlane.xlu1 %974 }
 0x62f   :  { %v926_v9 = vpop.f32.mrb[4].mxu1 }
 0x630   :  { %v3735_v36 = vrot.slane %v926_v9, %v986_v1  ;;  %v2768_v45 = vpop.f32.mrb[5].mxu1 }
 0x631   :  { %v929_v49 = vpop.f32.mrb[6].mxu1 }
 0x632   :  { %v2769_v57 = vpop.f32.mrb[7].mxu1  ;;  %v989_v50 = vadd.f32 %v3735_v36, %v955_v30  ;;  %v988_v55 = vadd.f32 %v3735_v36, %v953_v62  ;;  %v991_v60 = vadd.f32 %v3735_v36, %v959_v46  ;;  %v990_v8 = vadd.f32 %v3735_v36, %v957_v39 }
 0x633   :  { %v993_v59 = vadd.f32 %v3735_v36, %v963_v43  ;;  %v992_v17 = vadd.f32 %v3735_v36, %v961_v40  ;;  %v995_v10 = vadd.f32 %v3735_v36, %v967_v44  ;;  %v994_v21 = vadd.f32 %v3735_v36, %v965_v61 }
 0x634   :  { %vm1005_vm15 = vcmp.ge.f32.partialorder %v989_v50, 0.0  ;;  %v1021_v56 = vmul.f32 0.2, %v989_v50  ;;  %vm1004_vm9 = vcmp.ge.f32.partialorder %v988_v55, 0.0  ;;  %v1020_v4 = vmul.f32 0.2, %v988_v55 }
 0x635   :  { %vm1007_vm0 = vcmp.ge.f32.partialorder %v991_v60, 0.0  ;;  %v1023_v2 = vmul.f32 0.2, %v991_v60  ;;  %vm1006_vm5 = vcmp.ge.f32.partialorder %v990_v8, 0.0  ;;  %v1022_v37 = vmul.f32 0.2, %v990_v8 }
 0x636   :  { %v1037_v19 = vsel %vm1005_vm15, %v989_v50, %v1021_v56  ;;  %v1036_v3 = vsel %vm1004_vm9, %v988_v55, %v1020_v4  ;;  %v1025_v31 = vmul.f32 0.2, %v993_v59  ;;  %vm1009_vm4 = vcmp.ge.f32.partialorder %v993_v59, 0.0  ;;  %v977_v55 = vpop.xlane.xlu0 %976 }
 0x637   :  { %v3745_v12 = vsel %vm414_vm1, %v1037_v19, -1e+30  ;;  %v3749_v5 = vsel %vm413_vm2, %v1036_v3, -1e+30  ;;  %v1039_v16 = vsel %vm1007_vm0, %v991_v60, %v1023_v2  ;;  %v1038_v48 = vsel %vm1006_vm5, %v990_v8, %v1022_v37  ;;  %v979_v60 = vpop.xlane.xlu1 %978 }
 0x638   :  { %1070 = vmax.xlane.f32.xlu1 %v3745_v12  ;;  %1068 = vmax.xlane.f32.xlu0 %v3749_v5  ;;  %vm1008_vm15 = vcmp.ge.f32.partialorder %v992_v17, 0.0  ;;  %v1024_v22 = vmul.f32 0.2, %v992_v17  ;;  %v3757_v23 = vsel %vm416_vm7, %v1039_v16, -1e+30  ;;  %v1041_v25 = vsel %vm1009_vm4, %v993_v59, %v1025_v31 }
 0x639   :  { %v3761_v47 = vsel %vm415_vm8, %v1038_v48, -1e+30  ;;  %v1027_v62 = vmul.f32 0.2, %v995_v10  ;;  %v1026_v39 = vmul.f32 0.2, %v994_v21  ;;  %v997_v46 = vadd.f32 %v3735_v36, %v971_v11 }
 0x63a   :  { %v1040_v30 = vsel %vm1008_vm15, %v992_v17, %v1024_v22  ;;  %v996_v40 = vadd.f32 %v3735_v36, %v969_v53  ;;  %vm1011_vm0 = vcmp.ge.f32.partialorder %v995_v10, 0.0  ;;  %vm1010_vm5 = vcmp.ge.f32.partialorder %v994_v21, 0.0  ;;  %v981_v37 = vpop.xlane.xlu0 %980 }
 0x63b   :  { %v3769_v43 = vsel %vm418_vm11, %v1041_v25, -1e+30  ;;  %v3773_v61 = vsel %vm417_vm12, %v1040_v30, -1e+30  ;;  %v999_v44 = vadd.f32 %v3735_v36, %v975_v24  ;;  %v998_v9 = vadd.f32 %v3735_v36, %v973_v38  ;;  %v983_v19 = vpop.xlane.xlu1 %982 }
 0x63c   :  { %1074 = vmax.xlane.f32.xlu1 %v3757_v23  ;;  %1072 = vmax.xlane.f32.xlu0 %v3761_v47  ;;  %v1043_v45 = vsel %vm1011_vm0, %v995_v10, %v1027_v62  ;;  %v1042_v49 = vsel %vm1010_vm5, %v994_v21, %v1026_v39  ;;  %v1029_v57 = vmul.f32 0.2, %v997_v46  ;;  %v1028_v50 = vmul.f32 0.2, %v996_v40 }
 0x63d   :  { %vm1013_vm4 = vcmp.ge.f32.partialorder %v997_v46, 0.0  ;;  %vm1012_vm9 = vcmp.ge.f32.partialorder %v996_v40, 0.0  ;;  %v1001_v8 = vadd.f32 %v3735_v36, %v979_v60  ;;  %vm4241_vm15 = vcmp.gt.f32.partialorder %v3482_v63, 0.0 }
 0x63e   :  { %v3782_v59 = vsel %vm4241_vm15, %v1043_v45, -1e+30  ;;  %v3786_v17 = vsel %vm419_vm3, %v1042_v49, -1e+30  ;;  %v1031_v56 = vmul.f32 0.2, %v999_v44  ;;  %v1000_v4 = vadd.f32 %v3735_v36, %v977_v55 }
 0x63f   :  { %v1045_v53 = vsel %vm1013_vm4, %v997_v46, %v1029_v57  ;;  %v1044_v11 = vsel %vm1012_vm9, %v996_v40, %v1028_v50  ;;  %vm1015_vm0 = vcmp.ge.f32.partialorder %v999_v44, 0.0  ;;  %v1030_v2 = vmul.f32 0.2, %v998_v9 }
 0x640   :  { %1078 = vmax.xlane.f32.xlu1 %v3769_v43  ;;  %1076 = vmax.xlane.f32.xlu0 %v3773_v61  ;;  %vm1014_vm5 = vcmp.ge.f32.partialorder %v998_v9, 0.0  ;;  %v3793_v3 = vsel %vm422_vm6, %v1045_v53, -1e+30  ;;  %vm4242_vm15 = vcmp.gt.f32.partialorder %v3519_v14, 0.0  ;;  %v1047_v10 = vsel %vm1015_vm0, %v999_v44, %v1031_v56 }
 0x641   :  { %v3797_v31 = vsel %vm4242_vm15, %v1044_v11, -1e+30  ;;  %v1033_v16 = vmul.f32 0.2, %v1001_v8  ;;  %v1046_v48 = vsel %vm1014_vm5, %v998_v9, %v1030_v2  ;;  %v1032_v21 = vmul.f32 0.2, %v1000_v4 }
 0x642   :  { %v1003_v22 = vadd.f32 %v3735_v36, %v983_v19  ;;  %v1002_v38 = vadd.f32 %v3735_v36, %v981_v37  ;;  %vm1017_vm4 = vcmp.ge.f32.partialorder %v1001_v8, 0.0  ;;  %vm1016_vm9 = vcmp.ge.f32.partialorder %v1000_v4, 0.0 }
 0x643   :  { %v3805_v24 = vsel %vm424_vm14, %v1047_v10, -1e+30  ;;  %vm4243_vm15 = vcmp.gt.f32.partialorder %v3535_v29, 0.0  ;;  %v1049_v62 = vsel %vm1017_vm4, %v1001_v8, %v1033_v16  ;;  %v1048_v30 = vsel %vm1016_vm9, %v1000_v4, %v1032_v21 }
 0x644   :  { %1082 = vmax.xlane.f32.xlu1 %v3782_v59  ;;  %1080 = vmax.xlane.f32.xlu0 %v3786_v17  ;;  %v3809_v25 = vsel %vm4243_vm15, %v1046_v48, -1e+30  ;;  %v1035_v39 = vmul.f32 0.2, %v1003_v22  ;;  %v1034_v46 = vmul.f32 0.2, %v1002_v38 }
 0x645   :  { %vm1019_vm0 = vcmp.ge.f32.partialorder %v1003_v22, 0.0  ;;  %vm1018_vm5 = vcmp.ge.f32.partialorder %v1002_v38, 0.0  ;;  %v3815_v36 = vsel %vm426_vm10, %v1049_v62, -1e+30  ;;  %v3819_v40 = vsel %vm4240_vm13, %v1048_v30, -1e+30 }
 0x646   :  { %v1051_v44 = vsel %vm1019_vm0, %v1003_v22, %v1035_v39  ;;  %v1050_v9 = vsel %vm1018_vm5, %v1002_v38, %v1034_v46  ;;  %vm4244_vm4 = vcmp.gt.f32.partialorder %v3588_v6, 0.0  ;;  %vm4245_vm9 = vcmp.gt.f32.partialorder %v3593_v7, 0.0 }
 0x647   :  { %v3825_v45 = vsel %vm4244_vm4, %v1051_v44, -1e+30  ;;  %v3829_v49 = vsel %vm4245_vm9, %v1050_v9, -1e+30  ;;  %vm4246_vm15 = vmmov 0  }
 0x648   :  { %1086 = vmax.xlane.f32.xlu1 %v3793_v3  ;;  %1084 = vmax.xlane.f32.xlu0 %v3797_v31 }
 0x64c   :  { %1090 = vmax.xlane.f32.xlu1 %v3805_v24  ;;  %1088 = vmax.xlane.f32.xlu0 %v3809_v25 }
 0x650   :  { %1094 = vmax.xlane.f32.xlu1 %v3815_v36  ;;  %1092 = vmax.xlane.f32.xlu0 %v3819_v40 }
 0x654   :  { %1098 = vmax.xlane.f32.xlu1 %v3825_v45  ;;  %1096 = vmax.xlane.f32.xlu0 %v3829_v49 }
 0x6c5   :  { %v1071_v57 = vpop.xlane.xlu1 %1070  ;;  %v1069_v50 = vpop.xlane.xlu0 %1068 }
 0x6c6   :  { %v1101_v55 = vsub.f32 %v3745_v12, %v1071_v57  ;;  %v1100_v60 = vsub.f32 %v3749_v5, %v1069_v50 }
 0x6c8   :  { %v1118_v8 = vmul.f32 1.442695, %v1101_v55  ;;  %v1116_v56 = vmul.f32 1.442695, %v1100_v60 }
 0x6c9   :  { %v1075_v4 = vpop.xlane.xlu1 %1074  ;;  %v1073_v53 = vpop.xlane.xlu0 %1072 }
 0x6ca   :  { %3107 = vpow2.f32 %v1118_v8  ;;  %v1103_v11 = vsub.f32 %v3757_v23, %v1075_v4  ;;  %v1102_v2 = vsub.f32 %v3761_v47, %v1073_v53 }
 0x6cb   :  { %3109 = vpow2.f32 %v1116_v56 }
 0x6cc   :  { %v1122_v37 = vmul.f32 1.442695, %v1103_v11  ;;  %v1120_v19 = vmul.f32 1.442695, %v1102_v2 }
 0x6cd   :  { %v1079_v10 = vpop.xlane.xlu1 %1078  ;;  %v1077_v16 = vpop.xlane.xlu0 %1076 }
 0x6ce   :  { %3111 = vpow2.f32 %v1122_v37  ;;  %v1105_v48 = vsub.f32 %v3769_v43, %v1079_v10  ;;  %v1104_v12 = vsub.f32 %v3773_v61, %v1077_v16 }
 0x6cf   :  { %3113 = vpow2.f32 %v1120_v19 }
 0x6d0   :  { %v1126_v5 = vmul.f32 1.442695, %v1105_v48  ;;  %v1124_v21 = vmul.f32 1.442695, %v1104_v12 }
 0x6d1   :  { %v1083_v22 = vpop.xlane.xlu1 %1082  ;;  %v1081_v38 = vpop.xlane.xlu0 %1080 }
 0x6d2   :  { %3115 = vpow2.f32 %v1126_v5  ;;  %v1107_v23 = vsub.f32 %v3782_v59, %v1083_v22  ;;  %v1106_v47 = vsub.f32 %v3786_v17, %v1081_v38 }
 0x6d3   :  { %3117 = vpow2.f32 %v1124_v21 }
 0x6d4   :  { %v3841_v62 = vpop.eup %3107  ;;  %v1130_v30 = vmul.f32 1.442695, %v1107_v23  ;;  %v1128_v39 = vmul.f32 1.442695, %v1106_v47 }
 0x6d5   :  { %v3843_v46 = vpop.eup %3109  ;;  %1150 = vadd.xlane.f32.xlu1 %v3841_v62  ;;  %v1087_v43 = vpop.xlane.xlu1 %1086 }
 0x6d6   :  { %v1085_v61 = vpop.xlane.xlu0 %1084  ;;  %3119 = vpow2.f32 %v1130_v30  ;;  %v1109_v44 = vsub.f32 %v3793_v3, %v1087_v43  ;;  %1148 = vadd.xlane.f32.xlu0 %v3843_v46  ;;  %v3011_v43 = vld [vmem:[#allocation2 + $0x80] sm:$0xff]  }
 0x6d7   :  { %v1108_v59 = vsub.f32 %v3797_v31, %v1085_v61  ;;  %3121 = vpow2.f32 %v1128_v39  ;;  %2802 = vmatprep.subr.bf16.mxu0 %v3011_v43 }
 0x6d8   :  { %v3849_v17 = vpop.eup %3111  ;;  %v1134_v9 = vmul.f32 1.442695, %v1109_v44 }
 0x6d9   :  { %v1132_v57 = vmul.f32 1.442695, %v1108_v59  ;;  %v3851_v50 = vpop.eup %3113  ;;  %1154 = vadd.xlane.f32.xlu1 %v3849_v17  ;;  %v1091_v55 = vpop.xlane.xlu1 %1090 }
 0x6da   :  { %v1089_v60 = vpop.xlane.xlu0 %1088  ;;  %3123 = vpow2.f32 %v1134_v9  ;;  %v1111_v8 = vsub.f32 %v3805_v24, %v1091_v55  ;;  %1152 = vadd.xlane.f32.xlu0 %v3851_v50 }
 0x6db   :  { %v1110_v3 = vsub.f32 %v3809_v25, %v1089_v60  ;;  %3125 = vpow2.f32 %v1132_v57 }
 0x6dc   :  { %v3857_v31 = vpop.eup %3115  ;;  %v1138_v56 = vmul.f32 1.442695, %v1111_v8 }
 0x6dd   :  { %v1136_v4 = vmul.f32 1.442695, %v1110_v3  ;;  %v3859_v53 = vpop.eup %3117  ;;  %1158 = vadd.xlane.f32.xlu1 %v3857_v31  ;;  %v1095_v11 = vpop.xlane.xlu1 %1094 }
 0x6de   :  { %v1093_v2 = vpop.xlane.xlu0 %1092  ;;  %3127 = vpow2.f32 %v1138_v56  ;;  %v1113_v37 = vsub.f32 %v3815_v36, %v1095_v11  ;;  %1156 = vadd.xlane.f32.xlu0 %v3859_v53 }
 0x6df   :  { %v1112_v24 = vsub.f32 %v3819_v40, %v1093_v2  ;;  %3129 = vpow2.f32 %v1136_v4 }
 0x6e0   :  { %v3865_v25 = vpop.eup %3119  ;;  %v1142_v19 = vmul.f32 1.442695, %v1113_v37 }
 0x6e1   :  { %v1140_v10 = vmul.f32 1.442695, %v1112_v24  ;;  %v3867_v16 = vpop.eup %3121  ;;  %1162 = vadd.xlane.f32.xlu1 %v3865_v25  ;;  %v1099_v48 = vpop.xlane.xlu1 %1098 }
 0x6e2   :  { %v1097_v12 = vpop.xlane.xlu0 %1096  ;;  %3131 = vpow2.f32 %v1142_v19  ;;  %v1115_v5 = vsub.f32 %v3825_v45, %v1099_v48  ;;  %1160 = vadd.xlane.f32.xlu0 %v3867_v16 }
 0x6e3   :  { %v1114_v36 = vsub.f32 %v3829_v49, %v1097_v12  ;;  %3133 = vpow2.f32 %v1140_v10 }
 0x6e4   :  { %v3873_v40 = vpop.eup %3123  ;;  %v1146_v21 = vmul.f32 1.442695, %v1115_v5 }
 0x6e5   :  { %v1144_v22 = vmul.f32 1.442695, %v1114_v36  ;;  %v3875_v38 = vpop.eup %3125  ;;  %1166 = vadd.xlane.f32.xlu1 %v3873_v40 }
 0x6e6   :  { %3135 = vpow2.f32 %v1146_v21  ;;  %1164 = vadd.xlane.f32.xlu0 %v3875_v38 }
 0x6e7   :  { %3137 = vpow2.f32 %v1144_v22 }
 0x6e8   :  { %v3879_v23 = vpop.eup %3127 }
 0x6e9   :  { %v3881_v45 = vpop.eup %3129  ;;  %1170 = vadd.xlane.f32.xlu1 %v3879_v23 }
 0x6ea   :  { %1168 = vadd.xlane.f32.xlu0 %v3881_v45 }
 0x6ec   :  { %v3885_v49 = vpop.eup %3131 }
 0x6ed   :  { %v3887_v47 = vpop.eup %3133  ;;  %1174 = vadd.xlane.f32.xlu1 %v3885_v49 }
 0x6ee   :  { %1172 = vadd.xlane.f32.xlu0 %v3887_v47 }
 0x6f0   :  { %v3891_v30 = vpop.eup %3135 }
 0x6f1   :  { %v3893_v39 = vpop.eup %3137  ;;  %1178 = vadd.xlane.f32.xlu1 %v3891_v30 }
 0x6f2   :  { %1176 = vadd.xlane.f32.xlu0 %v3893_v39 }
 0x762   :  { %v1151_v61 = vpop.xlane.xlu1 %1150 }
 0x763   :  { %3139 = vrcp.f32 %v1151_v61  ;;  %v1149_v44 = vpop.xlane.xlu0 %1148 }
 0x764   :  { %3141 = vrcp.f32 %v1149_v44 }
 0x766   :  { %v1155_v59 = vpop.xlane.xlu1 %1154 }
 0x767   :  { %3143 = vrcp.f32 %v1155_v59  ;;  %v1153_v9 = vpop.xlane.xlu0 %1152  ;;  %v3013_v59 = vld [vmem:[#allocation2 + $0x90] sm:$0xff]  }
 0x768   :  { %3145 = vrcp.f32 %v1153_v9 }
 0x76a   :  { %v1159_v57 = vpop.xlane.xlu1 %1158 }
 0x76b   :  { %3147 = vrcp.f32 %v1159_v57  ;;  %v1157_v55 = vpop.xlane.xlu0 %1156 }
 0x76c   :  { %3149 = vrcp.f32 %v1157_v55 }
 0x76d   :  { %v3140_v60 = vpop.eup %3139 }
 0x76e   :  { %v3142_v8 = vpop.eup %3141  ;;  %v1163_v3 = vpop.xlane.xlu1 %1162  ;;  %v1183_v56 = vmul.f32 %v3140_v60, %v3841_v62  ;;  %v3012_v62 = vld [vmem:[#allocation2 + $0x88] sm:$0xff]  }
 0x76f   :  { %3151 = vrcp.f32 %v1163_v3  ;;  %v1161_v4 = vpop.xlane.xlu0 %1160  ;;  %v1181_v11 = vmul.f32 %v3142_v8, %v3843_v46 }
 0x770   :  { %3153 = vrcp.f32 %v1161_v4 }
 0x771   :  { %v3144_v2 = vpop.eup %3143  ;;  %v1212_v37 = vpack.c.bf16 %v1183_v56, %v1181_v11 }
 0x772   :  { %v3146_v24 = vpop.eup %3145  ;;  %v1187_v19 = vmul.f32 %v3144_v2, %v3849_v17  ;;  %v1167_v10 = vpop.xlane.xlu1 %1166 }
 0x773   :  { %v1185_v48 = vmul.f32 %v3146_v24, %v3851_v50  ;;  %3155 = vrcp.f32 %v1167_v10  ;;  %2786 = vmatprep.mubr.bf16.mxu0 %v1212_v37  ;;  %v1165_v12 = vpop.xlane.xlu0 %1164 }
 0x774   :  { %3157 = vrcp.f32 %v1165_v12  ;;  %v3016_v12 = vld [vmem:[#allocation2 + $0xa8] sm:$0xff]  }
 0x775   :  { %v3148_v5 = vpop.eup %3147  ;;  %v1213_v36 = vpack.c.bf16 %v1187_v19, %v1185_v48 }
 0x776   :  { %v3150_v21 = vpop.eup %3149  ;;  %v1171_v22 = vpop.xlane.xlu1 %1170  ;;  %v1191_v46 = vmul.f32 %v3148_v5, %v3857_v31 }
 0x777   :  { %3159 = vrcp.f32 %v1171_v22  ;;  %2787 = vmatmul.mubr.bf16.vlgmr.msra.gmra.mrb[48].mxu0 %v1213_v36  ;;  %v1169_v61 = vpop.xlane.xlu0 %1168  ;;  %v1189_v44 = vmul.f32 %v3150_v21, %v3859_v53  ;;  %v3014_v53 = vld [vmem:[#allocation2 + $0x98] sm:$0xff]  }
 0x778   :  { %3161 = vrcp.f32 %v1169_v61  ;;  %2803 = vmatpush3.bf16.msra.mxu0 %v3011_v43  ;;  %v3017_v61 = vld [vmem:[#allocation2 + $0xb0] sm:$0xff]  }
 0x779   :  { %v3152_v17 = vpop.eup %3151  ;;  %v1214_v50 = vpack.c.bf16 %v1191_v46, %v1189_v44  ;;  %2804 = vmatprep.subr.bf16.mxu0 %v3012_v62  ;;  %v3018_v44 = vld [vmem:[#allocation2 + $0xb8] sm:$0xff]  }
 0x77a   :  { %v3154_v9 = vpop.eup %3153  ;;  %v1175_v57 = vpop.xlane.xlu1 %1174  ;;  %v1195_v55 = vmul.f32 %v3152_v17, %v3865_v25 }
 0x77b   :  { %3163 = vrcp.f32 %v1175_v57  ;;  %2790 = vmatprep.mubr.bf16.mxu0 %v1214_v50  ;;  %v1173_v60 = vpop.xlane.xlu0 %1172  ;;  %v1193_v31 = vmul.f32 %v3154_v9, %v3867_v16  ;;  %v3015_v16 = vld [vmem:[#allocation2 + $0xa0] sm:$0xff]  }
 0x77c   :  { %3165 = vrcp.f32 %v1173_v60  ;;  %2805 = vmatpush3.bf16.msra.mxu0 %v3012_v62 }
 0x77d   :  { %v3156_v8 = vpop.eup %3155  ;;  %v1215_v3 = vpack.c.bf16 %v1195_v55, %v1193_v31  ;;  %2806 = vmatprep.subr.bf16.mxu0 %v3013_v59 }
 0x77e   :  { %v3158_v43 = vpop.eup %3157  ;;  %v1179_v56 = vpop.xlane.xlu1 %1178  ;;  %v1199_v4 = vmul.f32 %v3156_v8, %v3873_v40 }
 0x77f   :  { %3167 = vrcp.f32 %v1179_v56  ;;  %2791 = vmatmul.mubr.bf16.gmra.mrb[52].mxu0 %v1215_v3  ;;  %v1177_v11 = vpop.xlane.xlu0 %1176  ;;  %v1197_v25 = vmul.f32 %v3158_v43, %v3875_v38 }
 0x780   :  { %3169 = vrcp.f32 %v1177_v11  ;;  %2807 = vmatpush3.bf16.msra.mxu0 %v3013_v59 }
 0x781   :  { %v3160_v2 = vpop.eup %3159  ;;  %v1216_v37 = vpack.c.bf16 %v1199_v4, %v1197_v25  ;;  %2808 = vmatprep.subr.bf16.mxu0 %v3014_v53 }
 0x782   :  { %v3162_v24 = vpop.eup %3161  ;;  %v1203_v19 = vmul.f32 %v3160_v2, %v3879_v23 }
 0x783   :  { %2794 = vmatprep.mubr.bf16.mxu0 %v1216_v37  ;;  %v1201_v10 = vmul.f32 %v3162_v24, %v3881_v45 }
 0x784   :  { %2809 = vmatpush3.bf16.msra.mxu0 %v3014_v53 }
 0x785   :  { %v3164_v48 = vpop.eup %3163  ;;  %v1217_v40 = vpack.c.bf16 %v1203_v19, %v1201_v10  ;;  %2810 = vmatprep.subr.bf16.mxu0 %v3015_v16 }
 0x786   :  { %v3166_v5 = vpop.eup %3165  ;;  %v1207_v38 = vmul.f32 %v3164_v48, %v3885_v49  ;;  %v1222_v49 = vsub.s32 5, %v3372_v34 }
 0x787   :  { %2795 = vmatmul.mubr.bf16.gmra.mrb[56].mxu0 %v1217_v40  ;;  %v1205_v36 = vmul.f32 %v3166_v5, %v3887_v47  ;;  %v3917_v47 = vld [vmem:[%s4231_s6] sm:$0xff] }
 0x788   :  { %2811 = vmatpush3.bf16.msra.mxu0 %v3015_v16 }
 0x789   :  { %v3168_v62 = vpop.eup %3167  ;;  %v1218_v21 = vpack.c.bf16 %v1207_v38, %v1205_v36  ;;  %2812 = vmatprep.subr.bf16.mxu0 %v3016_v12 }
 0x78a   :  { %v3170_v22 = vpop.eup %3169  ;;  %v1211_v23 = vmul.f32 %v3168_v62, %v3891_v30  ;;  %v1223_v30 = vrot.slane %v3917_v47, %v1222_v49 }
 0x78b   :  { %2798 = vmatprep.mubr.bf16.mxu0 %v1218_v21  ;;  %v1209_v45 = vmul.f32 %v3170_v22, %v3893_v39 }
 0x78c   :  { %2813 = vmatpush3.bf16.msra.mxu0 %v3016_v12 }
 0x78d   :  { %v1219_v46 = vpack.c.bf16 %v1211_v23, %v1209_v45  ;;  %2814 = vmatprep.subr.bf16.mxu0 %v3017_v61 }
 0x78f   :  { %2799 = vmatmul.mubr.bf16.gmra.mrb[60].mxu0 %v1219_v46 }
 0x790   :  { %2815 = vmatpush3.bf16.msra.mxu0 %v3017_v61 }
 0x791   :  { %2816 = vmatprep.subr.bf16.mxu0 %v3018_v44 }
 0x794   :  { %2817 = vmatpush3.bf16.msra.mxu0 %v3018_v44 }
 0x84a   :  { %v2788_v17 = vpop.f32.mrb[48].mxu0 }
 0x84b   :  { %v1267_v39 = vadd.f32 %v2788_v17, %v1223_v30  ;;  %v1258_v50 = vpop.f32.mrb[49].mxu0 }
 0x84c   :  { %v1259_v59 = vadd.f32 %v1258_v50, %v1223_v30  ;;  %v2789_v9 = vpop.f32.mrb[50].mxu0 }
 0x84d   :  { %v1270_v57 = vadd.f32 %v2789_v9, %v1223_v30  ;;  %v1261_v55 = vpop.f32.mrb[51].mxu0  ;;  %v1323_v31 = vmax.f32 %v1267_v39, 0.0 }
 0x84e   :  { %v1262_v60 = vadd.f32 %v1261_v55, %v1223_v30  ;;  %v1321_v3 = vmax.f32 %v1259_v59, 0.0 }
 0x84f   :  { %v1324_v8 = vmax.f32 %v1270_v57, 0.0 }
 0x850   :  { %v1322_v53 = vmax.f32 %v1262_v60, 0.0 }
 0x851   :  { %v1338_v43 = vpack.c.bf16 %v1324_v8, %v1323_v31 }
 0x852   :  { %v1337_v56 = vpack.c.bf16 %v1322_v53, %v1321_v3  ;;  %v2792_v4 = vpop.f32.mrb[52].mxu0 }
 0x853   :  { %v1283_v11 = vadd.f32 %v2792_v4, %v1223_v30  ;;  %v1274_v25 = vpop.f32.mrb[53].mxu0 }
 0x854   :  { %v1275_v2 = vadd.f32 %v1274_v25, %v1223_v30  ;;  %v2793_v37 = vpop.f32.mrb[54].mxu0  ;;  %2818 = vmatprep.mubr.bf16.mxu0 %v1337_v56 }
 0x855   :  { %v1286_v16 = vadd.f32 %v2793_v37, %v1223_v30  ;;  %v1277_v24 = vpop.f32.mrb[55].mxu0  ;;  %2819 = vmatmul.mubr.bf16.vlgmr.msra.gmra.mrb[64].mxu0 %v1338_v43  ;;  %v1327_v10 = vmax.f32 %v1283_v11, 0.0  ;;  %v1557_v37 = vsub.s32 7, %v3372_v34 }
 0x856   :  { %v1278_v19 = vadd.f32 %v1277_v24, %v1223_v30  ;;  %v1325_v40 = vmax.f32 %v1275_v2, 0.0 }
 0x857   :  { %v1328_v48 = vmax.f32 %v1286_v16, 0.0  ;;  %v3922_v16 = vrot.slane %v3917_v47, %v1557_v37 }
 0x858   :  { %v1326_v12 = vmax.f32 %v1278_v19, 0.0 }
 0x859   :  { %v1340_v5 = vpack.c.bf16 %v1328_v48, %v1327_v10 }
 0x85a   :  { %v1339_v38 = vpack.c.bf16 %v1326_v12, %v1325_v40  ;;  %v2796_v36 = vpop.f32.mrb[56].mxu0 }
 0x85b   :  { %v1299_v62 = vadd.f32 %v2796_v36, %v1223_v30  ;;  %v1290_v21 = vpop.f32.mrb[57].mxu0 }
 0x85c   :  { %v1291_v22 = vadd.f32 %v1290_v21, %v1223_v30  ;;  %v2797_v23 = vpop.f32.mrb[58].mxu0  ;;  %2822 = vmatprep.mubr.bf16.mxu0 %v1339_v38 }
 0x85d   :  { %v1302_v45 = vadd.f32 %v2797_v23, %v1223_v30  ;;  %v1293_v46 = vpop.f32.mrb[59].mxu0  ;;  %2823 = vmatmul.mubr.bf16.gmra.mrb[68].mxu0 %v1340_v5  ;;  %v1331_v44 = vmax.f32 %v1299_v62, 0.0 }
 0x85e   :  { %v1294_v61 = vadd.f32 %v1293_v46, %v1223_v30  ;;  %v1329_v17 = vmax.f32 %v1291_v22, 0.0 }
 0x85f   :  { %v1332_v49 = vmax.f32 %v1302_v45, 0.0 }
 0x860   :  { %v1330_v39 = vmax.f32 %v1294_v61, 0.0 }
 0x861   :  { %v1342_v50 = vpack.c.bf16 %v1332_v49, %v1331_v44 }
 0x862   :  { %v1341_v59 = vpack.c.bf16 %v1330_v39, %v1329_v17  ;;  %v2800_v9 = vpop.f32.mrb[60].mxu0 }
 0x863   :  { %v1315_v57 = vadd.f32 %v2800_v9, %v1223_v30  ;;  %v1306_v55 = vpop.f32.mrb[61].mxu0 }
 0x864   :  { %v1307_v60 = vadd.f32 %v1306_v55, %v1223_v30  ;;  %v2801_v31 = vpop.f32.mrb[62].mxu0  ;;  %2826 = vmatprep.mubr.bf16.mxu0 %v1341_v59 }
 0x865   :  { %v1318_v8 = vadd.f32 %v2801_v31, %v1223_v30  ;;  %v1309_v3 = vpop.f32.mrb[63].mxu0  ;;  %2827 = vmatmul.mubr.bf16.gmra.mrb[72].mxu0 %v1342_v50  ;;  %v1335_v43 = vmax.f32 %v1315_v57, 0.0 }
 0x866   :  { %v1310_v53 = vadd.f32 %v1309_v3, %v1223_v30  ;;  %v1333_v4 = vmax.f32 %v1307_v60, 0.0 }
 0x867   :  { %v1336_v56 = vmax.f32 %v1318_v8, 0.0 }
 0x868   :  { %v1334_v11 = vmax.f32 %v1310_v53, 0.0 }
 0x869   :  { %v1344_v25 = vpack.c.bf16 %v1336_v56, %v1335_v43 }
 0x86a   :  { %v1343_v2 = vpack.c.bf16 %v1334_v11, %v1333_v4 }
 0x86c   :  { %2830 = vmatprep.mubr.bf16.mxu0 %v1343_v2 }
 0x86d   :  { %2831 = vmatmul.mubr.bf16.gmra.mrb[76].mxu0 %v1344_v25 }
 0x928   :  { %v2820_v24 = vpop.f32.mrb[64].mxu0 }
 0x929   :  { %v1444_v19 = vpop.f32.mrb[65].mxu0  ;;  %v1561_v38 = vmul.f32 %v2820_v24, %v3922_v16 }
 0x92a   :  { %v2821_v10 = vpop.f32.mrb[66].mxu0  ;;  %v1559_v48 = vmul.f32 %v3922_v16, %v1444_v19 }
 0x92b   :  { %v1508_v40 = vpack.c.bf16 %v2821_v10, %v2820_v24  ;;  %v1447_v30 = vpop.f32.mrb[67].mxu0  ;;  %v1562_v47 = vmul.f32 %v2821_v10, %v3922_v16 }
 0x92c   :  { %v1507_v12 = vpack.c.bf16 %v1447_v30, %v1444_v19  ;;  %1575 = vadd.xlane.f32.xlu0 %v1559_v48  ;;  %v1560_v5 = vmul.f32 %v3922_v16, %v1447_v30 }
 0x92e   :  { %1577 = vadd.xlane.f32.xlu1 %v1560_v5  ;;  %2835 = vmatpush3.bf16.xpose.msra.mxu1 %v1507_v12 }
 0x92f   :  { %2854 = vmatprep.subr.bf16.mxu0 %v1507_v12  ;;  %2836 = vmatprep.subr.bf16.mxu1 %v3264_v32 }
 0x930   :  { %2855 = vmatpush3.bf16.msra.mxu0 %v1507_v12  ;;  %1579 = vadd.xlane.f32.xlu0 %v1561_v38  ;;  %v2824_v36 = vpop.f32.mrb[68].mxu0  ;;  %v1609_v12 = vsub.s32 6, %v3372_v34 }
 0x931   :  { %2856 = vmatprep.subr.bf16.mxu0 %v1508_v40  ;;  %v1460_v62 = vpop.f32.mrb[69].mxu0  ;;  %v1565_v44 = vmul.f32 %v2824_v36, %v3922_v16 }
 0x932   :  { %v1563_v21 = vmul.f32 %v3922_v16, %v1460_v62  ;;  %1581 = vadd.xlane.f32.xlu1 %v1562_v47  ;;  %v2825_v22 = vpop.f32.mrb[70].mxu0 }
 0x933   :  { %v1510_v23 = vpack.c.bf16 %v2825_v22, %v2824_v36  ;;  %v1463_v45 = vpop.f32.mrb[71].mxu0  ;;  %v1566_v49 = vmul.f32 %v2825_v22, %v3922_v16 }
 0x934   :  { %v1509_v46 = vpack.c.bf16 %v1463_v45, %v1460_v62  ;;  %v1564_v61 = vmul.f32 %v3922_v16, %v1463_v45  ;;  %2857 = vmatpush3.bf16.msra.mxu0 %v1508_v40  ;;  %1583 = vadd.xlane.f32.xlu0 %v1563_v21 }
 0x936   :  { %2837 = vmatpush3.bf16.xpose.msra.mxu1 %v1508_v40  ;;  %1585 = vadd.xlane.f32.xlu1 %v1564_v61 }
 0x937   :  { %2858 = vmatprep.subr.bf16.mxu0 %v1509_v46  ;;  %2838 = vmatprep.subr.bf16.mxu1 %v3264_v32 }
 0x938   :  { %2859 = vmatpush3.bf16.msra.mxu0 %v1509_v46  ;;  %1587 = vadd.xlane.f32.xlu0 %v1565_v44  ;;  %v2828_v17 = vpop.f32.mrb[72].mxu0 }
 0x939   :  { %2860 = vmatprep.subr.bf16.mxu0 %v1510_v23  ;;  %v1476_v39 = vpop.f32.mrb[73].mxu0  ;;  %v1569_v31 = vmul.f32 %v2828_v17, %v3922_v16 }
 0x93a   :  { %v1567_v50 = vmul.f32 %v3922_v16, %v1476_v39  ;;  %1589 = vadd.xlane.f32.xlu1 %v1566_v49  ;;  %v2829_v59 = vpop.f32.mrb[74].mxu0 }
 0x93b   :  { %v1512_v9 = vpack.c.bf16 %v2829_v59, %v2828_v17  ;;  %v1479_v57 = vpop.f32.mrb[75].mxu0  ;;  %v1570_v8 = vmul.f32 %v2829_v59, %v3922_v16 }
 0x93c   :  { %v1511_v55 = vpack.c.bf16 %v1479_v57, %v1476_v39  ;;  %v1568_v60 = vmul.f32 %v3922_v16, %v1479_v57  ;;  %2861 = vmatpush3.bf16.msra.mxu0 %v1510_v23  ;;  %1591 = vadd.xlane.f32.xlu0 %v1567_v50 }
 0x93e   :  { %2839 = vmatpush3.bf16.xpose.msra.mxu1 %v1509_v46  ;;  %1593 = vadd.xlane.f32.xlu1 %v1568_v60 }
 0x93f   :  { %2862 = vmatprep.subr.bf16.mxu0 %v1511_v55  ;;  %2840 = vmatprep.subr.bf16.mxu1 %v3264_v32 }
 0x940   :  { %2863 = vmatpush3.bf16.msra.mxu0 %v1511_v55  ;;  %1595 = vadd.xlane.f32.xlu0 %v1569_v31  ;;  %v2832_v3 = vpop.f32.mrb[76].mxu0 }
 0x941   :  { %2864 = vmatprep.subr.bf16.mxu0 %v1512_v9  ;;  %v1492_v53 = vpop.f32.mrb[77].mxu0  ;;  %v1573_v37 = vmul.f32 %v2832_v3, %v3922_v16 }
 0x942   :  { %v1571_v43 = vmul.f32 %v3922_v16, %v1492_v53  ;;  %1597 = vadd.xlane.f32.xlu1 %v1570_v8  ;;  %v2833_v56 = vpop.f32.mrb[78].mxu0 }
 0x943   :  { %v1514_v4 = vpack.c.bf16 %v2833_v56, %v2832_v3  ;;  %v1495_v11 = vpop.f32.mrb[79].mxu0  ;;  %v1574_v24 = vmul.f32 %v2833_v56, %v3922_v16 }
 0x944   :  { %v1513_v25 = vpack.c.bf16 %v1495_v11, %v1492_v53  ;;  %v1572_v2 = vmul.f32 %v3922_v16, %v1495_v11  ;;  %2865 = vmatpush3.bf16.msra.mxu0 %v1512_v9  ;;  %1599 = vadd.xlane.f32.xlu0 %v1571_v43 }
 0x946   :  { %2841 = vmatpush3.bf16.xpose.msra.mxu1 %v1510_v23  ;;  %1601 = vadd.xlane.f32.xlu1 %v1572_v2 }
 0x947   :  { %2866 = vmatprep.subr.bf16.mxu0 %v1513_v25  ;;  %2842 = vmatprep.subr.bf16.mxu1 %v3264_v32 }
 0x948   :  { %2867 = vmatpush3.bf16.msra.mxu0 %v1513_v25  ;;  %1603 = vadd.xlane.f32.xlu0 %v1573_v37 }
 0x949   :  { %2868 = vmatprep.subr.bf16.mxu0 %v1514_v4 }
 0x94a   :  { %1605 = vadd.xlane.f32.xlu1 %v1574_v24 }
 0x94c   :  { %2869 = vmatpush3.bf16.msra.mxu0 %v1514_v4 }
 0x94d   :  { %2886 = vmatprep.subr.bf16.mxu0 %v3264_v32 }
 0x94e   :  { %2843 = vmatpush3.bf16.xpose.msra.mxu1 %v1511_v55 }
 0x94f   :  { %2844 = vmatprep.subr.bf16.mxu1 %v3264_v32 }
 0x956   :  { %2845 = vmatpush3.bf16.xpose.msra.mxu1 %v1512_v9 }
 0x957   :  { %2846 = vmatprep.subr.bf16.mxu1 %v3264_v32 }
 0x95e   :  { %2847 = vmatpush3.bf16.xpose.msra.mxu1 %v1513_v25 }
 0x95f   :  { %2848 = vmatprep.subr.bf16.mxu1 %v3264_v32 }
 0x966   :  { %2849 = vmatpush3.bf16.xpose.msra.mxu1 %v1514_v4 }
 0x967   :  { %2906 = vmatprep.subr.bf16.mxu1 %v3264_v32 }
 0x96d   :  { %2851 = vmatmul.mubr.bf16.vlgmr.msra.gmra.mrb[8].mxu1 %v3413_v15 }
 0x96e   :  { %2922 = vmatprep.mubr.msk.bf16.mxu1 %vm4246_vm15, %v3264_v32 }
 0x9b9   :  { %v1576_v16 = vpop.xlane.xlu0 %1575 }
 0x9bb   :  { %v1578_v19 = vpop.xlane.xlu1 %1577 }
 0x9bd   :  { %v1580_v10 = vpop.xlane.xlu0 %1579 }
 0x9bf   :  { %v1582_v48 = vpop.xlane.xlu1 %1581 }
 0x9c1   :  { %v1584_v40 = vpop.xlane.xlu0 %1583 }
 0x9c3   :  { %v1586_v30 = vpop.xlane.xlu1 %1585 }
 0x9c5   :  { %v1588_v5 = vpop.xlane.xlu0 %1587 }
 0x9c7   :  { %v1590_v38 = vpop.xlane.xlu1 %1589 }
 0x9c9   :  { %v1592_v39 = vpop.xlane.xlu0 %1591 }
 0x9cb   :  { %v1594_v50 = vpop.xlane.xlu1 %1593 }
 0x9cd   :  { %v1596_v4 = vpop.xlane.xlu0 %1595 }
 0x9cf   :  { %v1598_v11 = vpop.xlane.xlu1 %1597 }
 0x9d3   :  { %v1602_v51 = vpop.xlane.xlu1 %1601 }
 0xa40   :  { %v1549_v47 = vpop.f32.mrb[8].mxu1 }
 0xa41   :  { %v3953_v36 = vrot.slane %v1549_v47, %v1609_v12  ;;  %v2852_v62 = vpop.f32.mrb[9].mxu1  ;;  %v1600_v47 = vpop.xlane.xlu0 %1599 }
 0xa42   :  { %v1552_v21 = vpop.f32.mrb[10].mxu1 }
 0xa43   :  { %v2853_v22 = vpop.f32.mrb[11].mxu1  ;;  %v1612_v15 = vadd.f32 %v3953_v36, %v1578_v19  ;;  %v1611_v23 = vadd.f32 %v3953_v36, %v1576_v16  ;;  %v1614_v45 = vadd.f32 %v3953_v36, %v1582_v48  ;;  %v1613_v46 = vadd.f32 %v3953_v36, %v1580_v10 }
 0xa44   :  { %v1616_v61 = vadd.f32 %v3953_v36, %v1586_v30  ;;  %v1615_v44 = vadd.f32 %v3953_v36, %v1584_v40  ;;  %v1618_v3 = vadd.f32 %v3953_v36, %v1590_v38  ;;  %v1617_v56 = vadd.f32 %v3953_v36, %v1588_v5 }
 0xa45   :  { %vm1628_vm0 = vcmp.ge.f32.partialorder %v1612_v15, 0.0  ;;  %v1644_v49 = vmul.f32 0.2, %v1612_v15  ;;  %vm1627_vm5 = vcmp.ge.f32.partialorder %v1611_v23, 0.0  ;;  %v1643_v17 = vmul.f32 0.2, %v1611_v23 }
 0xa46   :  { %vm1630_vm4 = vcmp.ge.f32.partialorder %v1614_v45, 0.0  ;;  %v1646_v59 = vmul.f32 0.2, %v1614_v45  ;;  %vm1629_vm9 = vcmp.ge.f32.partialorder %v1613_v46, 0.0  ;;  %v1645_v9 = vmul.f32 0.2, %v1613_v46 }
 0xa47   :  { %v1660_v57 = vsel %vm1628_vm0, %v1612_v15, %v1644_v49  ;;  %v1659_v55 = vsel %vm1627_vm5, %v1611_v23, %v1643_v17  ;;  %v1648_v8 = vmul.f32 0.2, %v1616_v61  ;;  %vm1632_vm13 = vcmp.ge.f32.partialorder %v1616_v61, 0.0 }
 0xa48   :  { %v3963_v60 = vsel %vm414_vm1, %v1660_v57, -1e+30  ;;  %v3967_v31 = vsel %vm413_vm2, %v1659_v55, -1e+30  ;;  %v1662_v53 = vsel %vm1630_vm4, %v1614_v45, %v1646_v59  ;;  %v1661_v43 = vsel %vm1629_vm9, %v1613_v46, %v1645_v9 }
 0xa49   :  { %1693 = vmax.xlane.f32.xlu1 %v3963_v60  ;;  %1691 = vmax.xlane.f32.xlu0 %v3967_v31  ;;  %vm1631_vm0 = vcmp.ge.f32.partialorder %v1615_v44, 0.0  ;;  %v1647_v26 = vmul.f32 0.2, %v1615_v44  ;;  %v3975_v27 = vsel %vm416_vm7, %v1662_v53, -1e+30  ;;  %v1664_v2 = vsel %vm1632_vm13, %v1616_v61, %v1648_v8  ;;  %v1604_v61 = vpop.xlane.xlu0 %1603 }
 0xa4a   :  { %v3979_v25 = vsel %vm415_vm8, %v1661_v43, -1e+30  ;;  %v1650_v37 = vmul.f32 0.2, %v1618_v3  ;;  %v1649_v16 = vmul.f32 0.2, %v1617_v56  ;;  %v1620_v19 = vadd.f32 %v3953_v36, %v1594_v50 }
 0xa4b   :  { %v1663_v24 = vsel %vm1631_vm0, %v1615_v44, %v1647_v26  ;;  %v1619_v10 = vadd.f32 %v3953_v36, %v1592_v39  ;;  %vm1634_vm1 = vcmp.ge.f32.partialorder %v1618_v3, 0.0  ;;  %vm1633_vm2 = vcmp.ge.f32.partialorder %v1617_v56, 0.0 }
 0xa4c   :  { %v3987_v41 = vsel %vm418_vm11, %v1664_v2, -1e+30  ;;  %v3991_v42 = vsel %vm417_vm12, %v1663_v24, -1e+30  ;;  %v1622_v48 = vadd.f32 %v3953_v36, %v1598_v11  ;;  %v1621_v40 = vadd.f32 %v3953_v36, %v1596_v4 }
 0xa4d   :  { %1697 = vmax.xlane.f32.xlu1 %v3975_v27  ;;  %1695 = vmax.xlane.f32.xlu0 %v3979_v25  ;;  %v1666_v30 = vsel %vm1634_vm1, %v1618_v3, %v1650_v37  ;;  %v1665_v12 = vsel %vm1633_vm2, %v1617_v56, %v1649_v16  ;;  %v1652_v5 = vmul.f32 0.2, %v1620_v19  ;;  %v1651_v38 = vmul.f32 0.2, %v1619_v10 }
 0xa4e   :  { %vm1636_vm7 = vcmp.ge.f32.partialorder %v1620_v19, 0.0  ;;  %vm1635_vm8 = vcmp.ge.f32.partialorder %v1619_v10, 0.0  ;;  %v1624_v52 = vadd.f32 %v3953_v36, %v1602_v51  ;;  %vm4247_vm11 = vcmp.gt.f32.partialorder %v3482_v63, 0.0  ;;  %v1606_v63 = vpop.xlane.xlu1 %1605 }
 0xa4f   :  { %v4000_v62 = vsel %vm4247_vm11, %v1666_v30, -1e+30  ;;  %v4004_v21 = vsel %vm419_vm3, %v1665_v12, -1e+30  ;;  %v1654_v22 = vmul.f32 0.2, %v1622_v48  ;;  %v1623_v15 = vadd.f32 %v3953_v36, %v1600_v47 }
 0xa50   :  { %v1668_v23 = vsel %vm1636_vm7, %v1620_v19, %v1652_v5  ;;  %v1667_v45 = vsel %vm1635_vm8, %v1619_v10, %v1651_v38  ;;  %vm1638_vm12 = vcmp.ge.f32.partialorder %v1622_v48, 0.0  ;;  %v1653_v46 = vmul.f32 0.2, %v1621_v40 }
 0xa51   :  { %1701 = vmax.xlane.f32.xlu1 %v3987_v41  ;;  %1699 = vmax.xlane.f32.xlu0 %v3991_v42  ;;  %vm1637_vm13 = vcmp.ge.f32.partialorder %v1621_v40, 0.0  ;;  %v4011_v44 = vsel %vm422_vm6, %v1668_v23, -1e+30  ;;  %vm4248_vm3 = vcmp.gt.f32.partialorder %v3519_v14, 0.0  ;;  %v1670_v49 = vsel %vm1638_vm12, %v1622_v48, %v1654_v22 }
 0xa52   :  { %v4015_v0 = vsel %vm4248_vm3, %v1667_v45, -1e+30  ;;  %v1656_v17 = vmul.f32 0.2, %v1624_v52  ;;  %v1669_v39 = vsel %vm1637_vm13, %v1621_v40, %v1653_v46  ;;  %v1655_v50 = vmul.f32 0.2, %v1623_v15 }
 0xa53   :  { %v1626_v59 = vadd.f32 %v3953_v36, %v1606_v63  ;;  %v1625_v9 = vadd.f32 %v3953_v36, %v1604_v61  ;;  %vm1640_vm5 = vcmp.ge.f32.partialorder %v1624_v52, 0.0  ;;  %vm1639_vm4 = vcmp.ge.f32.partialorder %v1623_v15, 0.0 }
 0xa54   :  { %v4023_v13 = vsel %vm424_vm14, %v1670_v49, -1e+30  ;;  %vm4249_vm6 = vcmp.gt.f32.partialorder %v3535_v29, 0.0  ;;  %v1672_v57 = vsel %vm1640_vm5, %v1624_v52, %v1656_v17  ;;  %v1671_v55 = vsel %vm1639_vm4, %v1623_v15, %v1655_v50 }
 0xa55   :  { %1705 = vmax.xlane.f32.xlu1 %v4000_v62  ;;  %1703 = vmax.xlane.f32.xlu0 %v4004_v21  ;;  %v4027_v14 = vsel %vm4249_vm6, %v1669_v39, -1e+30  ;;  %v1658_v8 = vmul.f32 0.2, %v1626_v59  ;;  %v1657_v3 = vmul.f32 0.2, %v1625_v9 }
 0xa56   :  { %vm1642_vm9 = vcmp.ge.f32.partialorder %v1626_v59, 0.0  ;;  %vm1641_vm0 = vcmp.ge.f32.partialorder %v1625_v9, 0.0  ;;  %v4033_v36 = vsel %vm426_vm10, %v1672_v57, -1e+30  ;;  %vm4250_vm14 = vcmp.gt.f32.partialorder %v3569_v58, 0.0 }
 0xa57   :  { %v4037_v28 = vsel %vm4250_vm14, %v1671_v55, -1e+30  ;;  %v1674_v29 = vsel %vm1642_vm9, %v1626_v59, %v1658_v8  ;;  %v1673_v53 = vsel %vm1641_vm0, %v1625_v9, %v1657_v3  ;;  %vm4251_vm1 = vcmp.gt.f32.partialorder %v3588_v6, 0.0 }
 0xa58   :  { %v4043_v43 = vsel %vm4251_vm1, %v1674_v29, -1e+30  ;;  %vm4252_vm2 = vcmp.gt.f32.partialorder %v3593_v7, 0.0 }
 0xa59   :  { %1709 = vmax.xlane.f32.xlu1 %v4011_v44  ;;  %1707 = vmax.xlane.f32.xlu0 %v4015_v0  ;;  %v4047_v56 = vsel %vm4252_vm2, %v1673_v53, -1e+30 }
 0xa5d   :  { %1713 = vmax.xlane.f32.xlu1 %v4023_v13  ;;  %1711 = vmax.xlane.f32.xlu0 %v4027_v14 }
 0xa61   :  { %1717 = vmax.xlane.f32.xlu1 %v4033_v36  ;;  %1715 = vmax.xlane.f32.xlu0 %v4037_v28 }
 0xa65   :  { %1721 = vmax.xlane.f32.xlu1 %v4043_v43  ;;  %1719 = vmax.xlane.f32.xlu0 %v4047_v56 }
 0xad6   :  { %v1694_v54 = vpop.xlane.xlu1 %1693  ;;  %v1692_v58 = vpop.xlane.xlu0 %1691 }
 0xad7   :  { %v1724_v26 = vsub.f32 %v3963_v60, %v1694_v54  ;;  %v1723_v4 = vsub.f32 %v3967_v31, %v1692_v58 }
 0xad9   :  { %v1741_v11 = vmul.f32 1.442695, %v1724_v26  ;;  %v1739_v2 = vmul.f32 1.442695, %v1723_v4 }
 0xada   :  { %v1698_v37 = vpop.xlane.xlu1 %1697  ;;  %v1696_v6 = vpop.xlane.xlu0 %1695 }
 0xadb   :  { %3171 = vpow2.f32 %v1741_v11  ;;  %v1726_v24 = vsub.f32 %v3975_v27, %v1698_v37  ;;  %v1725_v7 = vsub.f32 %v3979_v25, %v1696_v6  ;;  %v1978_v6 = vld [vmem:[%s4226_s1] sm:$0xff] }
 0xadc   :  { %3173 = vpow2.f32 %v1739_v2 }
 0xadd   :  { %v1745_v16 = vmul.f32 1.442695, %v1726_v24  ;;  %v1743_v19 = vmul.f32 1.442695, %v1725_v7  ;;  %v1970_v24 = vld [vmem:[%s4225_s0] sm:$0xff]  ;;  %v3266_v7 = vmov 0  }
 0xade   :  { %v1702_v10 = vpop.xlane.xlu1 %1701  ;;  %v1700_v48 = vpop.xlane.xlu0 %1699  ;;  %2994 = vset.pattern.permute.xlu1 %v3266_v7  ;;  %2993 = vset.pattern.permute.xlu0 %v3266_v7 }
 0xadf   :  { %3175 = vpow2.f32 %v1745_v16  ;;  %v1728_v40 = vsub.f32 %v3987_v41, %v1702_v10  ;;  %v1727_v60 = vsub.f32 %v3991_v42, %v1700_v48  ;;  %v2295_v16 = vld [vmem:[%s4227_s2] sm:$0xff] }
 0xae0   :  { %3177 = vpow2.f32 %v1743_v19 }
 0xae1   :  { %v1749_v31 = vmul.f32 1.442695, %v1728_v40  ;;  %v1747_v30 = vmul.f32 1.442695, %v1727_v60 }
 0xae2   :  { %v1706_v12 = vpop.xlane.xlu1 %1705  ;;  %v1704_v5 = vpop.xlane.xlu0 %1703 }
 0xae3   :  { %3179 = vpow2.f32 %v1749_v31  ;;  %v1730_v27 = vsub.f32 %v4000_v62, %v1706_v12  ;;  %v1729_v25 = vsub.f32 %v4004_v21, %v1704_v5 }
 0xae4   :  { %3181 = vpow2.f32 %v1747_v30 }
 0xae5   :  { %v4059_v38 = vpop.eup %3171  ;;  %v1753_v47 = vmul.f32 1.442695, %v1730_v27  ;;  %v1751_v51 = vmul.f32 1.442695, %v1729_v25 }
 0xae6   :  { %v4061_v52 = vpop.eup %3173  ;;  %1773 = vadd.xlane.f32.xlu1 %v4059_v38  ;;  %v1710_v41 = vpop.xlane.xlu1 %1709 }
 0xae7   :  { %v1708_v42 = vpop.xlane.xlu0 %1707  ;;  %3183 = vpow2.f32 %v1753_v47  ;;  %v1732_v22 = vsub.f32 %v4011_v44, %v1710_v41  ;;  %1771 = vadd.xlane.f32.xlu0 %v4061_v52 }
 0xae8   :  { %v1731_v62 = vsub.f32 %v4015_v0, %v1708_v42  ;;  %3185 = vpow2.f32 %v1751_v51 }
 0xae9   :  { %v4067_v21 = vpop.eup %3175  ;;  %v1757_v15 = vmul.f32 1.442695, %v1732_v22 }
 0xaea   :  { %v1755_v23 = vmul.f32 1.442695, %v1731_v62  ;;  %v4069_v45 = vpop.eup %3177  ;;  %1777 = vadd.xlane.f32.xlu1 %v4067_v21  ;;  %v1714_v46 = vpop.xlane.xlu1 %1713 }
 0xaeb   :  { %v1712_v61 = vpop.xlane.xlu0 %1711  ;;  %3187 = vpow2.f32 %v1757_v15  ;;  %v1734_v63 = vsub.f32 %v4023_v13, %v1714_v46  ;;  %1775 = vadd.xlane.f32.xlu0 %v4069_v45 }
 0xaec   :  { %v1733_v44 = vsub.f32 %v4027_v14, %v1712_v61  ;;  %3189 = vpow2.f32 %v1755_v23 }
 0xaed   :  { %v4075_v0 = vpop.eup %3179  ;;  %v1761_v49 = vmul.f32 1.442695, %v1734_v63 }
 0xaee   :  { %v1759_v17 = vmul.f32 1.442695, %v1733_v44  ;;  %v4077_v39 = vpop.eup %3181  ;;  %1781 = vadd.xlane.f32.xlu1 %v4075_v0  ;;  %v1718_v50 = vpop.xlane.xlu1 %1717 }
 0xaef   :  { %v1716_v59 = vpop.xlane.xlu0 %1715  ;;  %3191 = vpow2.f32 %v1761_v49  ;;  %v1736_v9 = vsub.f32 %v4033_v36, %v1718_v50  ;;  %1779 = vadd.xlane.f32.xlu0 %v4077_v39 }
 0xaf0   :  { %v1735_v13 = vsub.f32 %v4037_v28, %v1716_v59  ;;  %3193 = vpow2.f32 %v1759_v17 }
 0xaf1   :  { %v4083_v14 = vpop.eup %3183  ;;  %v1765_v57 = vmul.f32 1.442695, %v1736_v9 }
 0xaf2   :  { %v1763_v55 = vmul.f32 1.442695, %v1735_v13  ;;  %v4085_v8 = vpop.eup %3185  ;;  %1785 = vadd.xlane.f32.xlu1 %v4083_v14  ;;  %v1722_v3 = vpop.xlane.xlu1 %1721 }
 0xaf3   :  { %v1720_v29 = vpop.xlane.xlu0 %1719  ;;  %3195 = vpow2.f32 %v1765_v57  ;;  %v1738_v53 = vsub.f32 %v4043_v43, %v1722_v3  ;;  %1783 = vadd.xlane.f32.xlu0 %v4085_v8 }
 0xaf4   :  { %v1737_v36 = vsub.f32 %v4047_v56, %v1720_v29  ;;  %3197 = vpow2.f32 %v1763_v55 }
 0xaf5   :  { %v4091_v28 = vpop.eup %3187  ;;  %v1769_v54 = vmul.f32 1.442695, %v1738_v53 }
 0xaf6   :  { %v1767_v58 = vmul.f32 1.442695, %v1737_v36  ;;  %v4093_v26 = vpop.eup %3189  ;;  %1789 = vadd.xlane.f32.xlu1 %v4091_v28 }
 0xaf7   :  { %3199 = vpow2.f32 %v1769_v54  ;;  %1787 = vadd.xlane.f32.xlu0 %v4093_v26 }
 0xaf8   :  { %3201 = vpow2.f32 %v1767_v58 }
 0xaf9   :  { %v4097_v4 = vpop.eup %3191 }
 0xafa   :  { %v4099_v43 = vpop.eup %3193  ;;  %1793 = vadd.xlane.f32.xlu1 %v4097_v4 }
 0xafb   :  { %1791 = vadd.xlane.f32.xlu0 %v4099_v43 }
 0xafd   :  { %v4103_v56 = vpop.eup %3195 }
 0xafe   :  { %v4105_v11 = vpop.eup %3197  ;;  %1797 = vadd.xlane.f32.xlu1 %v4103_v56 }
 0xaff   :  { %1795 = vadd.xlane.f32.xlu0 %v4105_v11 }
 0xb01   :  { %v4109_v2 = vpop.eup %3199 }
 0xb02   :  { %v4111_v37 = vpop.eup %3201  ;;  %1801 = vadd.xlane.f32.xlu1 %v4109_v2 }
 0xb03   :  { %1799 = vadd.xlane.f32.xlu0 %v4111_v37 }
 0xb13   :  { %1980 = vperm.xlu1 %2994, %v1978_v6  }
 0xb17   :  { %2298 = vperm.xlu1 %2994, %v2295_v16  }
 0xb19   :  { %1972 = vperm.xlu0 %2993, %v1970_v24  }
 0xb73   :  { %v1774_v19 = vpop.xlane.xlu1 %1773 }
 0xb74   :  { %3203 = vrcp.f32 %v1774_v19  ;;  %v1772_v10 = vpop.xlane.xlu0 %1771 }
 0xb75   :  { %3205 = vrcp.f32 %v1772_v10 }
 0xb77   :  { %v1778_v48 = vpop.xlane.xlu1 %1777 }
 0xb78   :  { %3207 = vrcp.f32 %v1778_v48  ;;  %v1776_v40 = vpop.xlane.xlu0 %1775 }
 0xb79   :  { %3209 = vrcp.f32 %v1776_v40 }
 0xb7b   :  { %v1782_v60 = vpop.xlane.xlu1 %1781 }
 0xb7c   :  { %3211 = vrcp.f32 %v1782_v60  ;;  %v1780_v31 = vpop.xlane.xlu0 %1779 }
 0xb7d   :  { %3213 = vrcp.f32 %v1780_v31 }
 0xb7e   :  { %v3204_v30 = vpop.eup %3203 }
 0xb7f   :  { %v3206_v12 = vpop.eup %3205  ;;  %v1786_v5 = vpop.xlane.xlu1 %1785  ;;  %v1806_v27 = vmul.f32 %v3204_v30, %v4059_v38 }
 0xb80   :  { %3215 = vrcp.f32 %v1786_v5  ;;  %v1784_v25 = vpop.xlane.xlu0 %1783  ;;  %v1804_v47 = vmul.f32 %v3206_v12, %v4061_v52 }
 0xb81   :  { %3217 = vrcp.f32 %v1784_v25 }
 0xb82   :  { %v3208_v51 = vpop.eup %3207  ;;  %v1835_v41 = vpack.c.bf16 %v1806_v27, %v1804_v47 }
 0xb83   :  { %v3210_v42 = vpop.eup %3209  ;;  %v1810_v22 = vmul.f32 %v3208_v51, %v4067_v21  ;;  %v1790_v62 = vpop.xlane.xlu1 %1789 }
 0xb84   :  { %v1808_v15 = vmul.f32 %v3210_v42, %v4069_v45  ;;  %3219 = vrcp.f32 %v1790_v62  ;;  %2870 = vmatprep.mubr.bf16.mxu0 %v1835_v41  ;;  %v1788_v23 = vpop.xlane.xlu0 %1787 }
 0xb85   :  { %3221 = vrcp.f32 %v1788_v23 }
 0xb86   :  { %v3212_v46 = vpop.eup %3211  ;;  %v1836_v61 = vpack.c.bf16 %v1810_v22, %v1808_v15 }
 0xb87   :  { %v3214_v38 = vpop.eup %3213  ;;  %v1794_v63 = vpop.xlane.xlu1 %1793  ;;  %v1814_v44 = vmul.f32 %v3212_v46, %v4075_v0 }
 0xb88   :  { %3223 = vrcp.f32 %v1794_v63  ;;  %2871 = vmatmul.mubr.bf16.vlgmr.msra.gmra.mrb[80].mxu0 %v1836_v61  ;;  %v1792_v52 = vpop.xlane.xlu0 %1791  ;;  %v1812_v49 = vmul.f32 %v3214_v38, %v4077_v39 }
 0xb89   :  { %3225 = vrcp.f32 %v1792_v52 }
 0xb8a   :  { %v3216_v21 = vpop.eup %3215  ;;  %v1837_v17 = vpack.c.bf16 %v1814_v44, %v1812_v49 }
 0xb8b   :  { %v3218_v50 = vpop.eup %3217  ;;  %v1798_v45 = vpop.xlane.xlu1 %1797  ;;  %v1818_v59 = vmul.f32 %v3216_v21, %v4083_v14 }
 0xb8c   :  { %3227 = vrcp.f32 %v1798_v45  ;;  %2874 = vmatprep.mubr.bf16.mxu0 %v1837_v17  ;;  %v1796_v9 = vpop.xlane.xlu0 %1795  ;;  %v1816_v13 = vmul.f32 %v3218_v50, %v4085_v8 }
 0xb8d   :  { %3229 = vrcp.f32 %v1796_v9 }
 0xb8e   :  { %v3220_v57 = vpop.eup %3219  ;;  %v1838_v0 = vpack.c.bf16 %v1818_v59, %v1816_v13 }
 0xb8f   :  { %v3222_v55 = vpop.eup %3221  ;;  %v1802_v3 = vpop.xlane.xlu1 %1801  ;;  %v1822_v29 = vmul.f32 %v3220_v57, %v4091_v28 }
 0xb90   :  { %3231 = vrcp.f32 %v1802_v3  ;;  %2875 = vmatmul.mubr.bf16.gmra.mrb[84].mxu0 %v1838_v0  ;;  %v1800_v39 = vpop.xlane.xlu0 %1799  ;;  %v1820_v53 = vmul.f32 %v3222_v55, %v4093_v26 }
 0xb91   :  { %3233 = vrcp.f32 %v1800_v39 }
 0xb92   :  { %v3224_v36 = vpop.eup %3223  ;;  %v1839_v14 = vpack.c.bf16 %v1822_v29, %v1820_v53 }
 0xb93   :  { %v3226_v54 = vpop.eup %3225  ;;  %v1826_v58 = vmul.f32 %v3224_v36, %v4097_v4 }
 0xb94   :  { %2878 = vmatprep.mubr.bf16.mxu0 %v1839_v14  ;;  %v1824_v8 = vmul.f32 %v3226_v54, %v4099_v43  ;;  %v4145_v43 = vld [vmem:[%s4231_s6 + $0x8] sm:$0xff] }
 0xb96   :  { %v3228_v6 = vpop.eup %3227  ;;  %v1840_v24 = vpack.c.bf16 %v1826_v58, %v1824_v8 }
 0xb97   :  { %v3230_v7 = vpop.eup %3229  ;;  %v1830_v16 = vmul.f32 %v3228_v6, %v4103_v56  ;;  %v4150_v56 = vrot.slane %v4145_v43, %v331_v20 }
 0xb98   :  { %2879 = vmatmul.mubr.bf16.gmra.mrb[88].mxu0 %v1840_v24  ;;  %v1828_v28 = vmul.f32 %v3230_v7, %v4105_v11 }
 0xb9a   :  { %v3232_v19 = vpop.eup %3231  ;;  %v1841_v10 = vpack.c.bf16 %v1830_v16, %v1828_v28 }
 0xb9b   :  { %v3234_v26 = vpop.eup %3233  ;;  %v1834_v48 = vmul.f32 %v3232_v19, %v4109_v2 }
 0xb9c   :  { %2882 = vmatprep.mubr.bf16.mxu0 %v1841_v10  ;;  %v1832_v40 = vmul.f32 %v3234_v26, %v4111_v37 }
 0xb9e   :  { %v1842_v4 = vpack.c.bf16 %v1834_v48, %v1832_v40  ;;  %v1969_v40 = vand.u32 127, %v277_v33  ;;  %v3019_v33 = vld [vmem:[#allocation2 + $0x100] sm:$0xff]  }
 0xba0   :  { %2883 = vmatmul.mubr.bf16.gmra.mrb[92].mxu0 %v1842_v4 }
 0xba1   :  { %2902 = vmatprep.mubr.msk.bf16.mxu0 %vm4246_vm15, %v3264_v32 }
 0xc5b   :  { %v2872_v11 = vpop.f32.mrb[80].mxu0 }
 0xc5c   :  { %v1890_v2 = vadd.f32 %v2872_v11, %v4150_v56  ;;  %v1881_v60 = vpop.f32.mrb[81].mxu0 }
 0xc5d   :  { %v1882_v37 = vadd.f32 %v1881_v60, %v4150_v56  ;;  %v2873_v31 = vpop.f32.mrb[82].mxu0  ;;  %v1981_v60 = vpop.permute.xlu1 %1980 }
 0xc5e   :  { %v1893_v30 = vadd.f32 %v2873_v31, %v4150_v56  ;;  %v1884_v12 = vpop.f32.mrb[83].mxu0  ;;  %v1946_v27 = vmax.f32 %v1890_v2, 0.0  ;;  %v1973_v2 = vpop.permute.xlu0 %1972  ;;  %vm1982_vm10 = vcmp.eq.s32.totalorder %v1969_v40, %v1981_v60  ;;  %v3021_v31 = vld [vmem:[#allocation2 + $0x108] sm:$0xff]  }
 0xc5f   :  { %v1885_v5 = vadd.f32 %v1884_v12, %v4150_v56  ;;  %v1944_v47 = vmax.f32 %v1882_v37, 0.0  ;;  %vm1974_vm7 = vcmp.eq.s32.totalorder %v1969_v40, %v1973_v2  ;;  %vm2440_vm8 = vmpackc.low %vm1982_vm10, %vm1982_vm10  ;;  %v3267_v37 = vmov 1.0|1.0   ;;  %v3023_v12 = vld [vmem:[#allocation2 + $0x110] sm:$0xff]  }
 0xc60   :  { %v1947_v25 = vmax.f32 %v1893_v30, 0.0  ;;  %vm2438_vm11 = vmpackc.low %vm1974_vm7, %vm1974_vm7  ;;  %v3022_v30 = vld [vmem:[#allocation2 + $0xc8] sm:$0xff]  }
 0xc61   :  { %v1945_v51 = vmax.f32 %v1885_v5, 0.0  ;;  %v3024_v5 = vld [vmem:[#allocation2 + $0xd0] sm:$0xff]  }
 0xc62   :  { %v1961_v41 = vpack.c.bf16 %v1947_v25, %v1946_v27  ;;  %v3025_v27 = vld [vmem:[#allocation2 + $0x118] sm:$0xff]  }
 0xc63   :  { %v1960_v42 = vpack.c.bf16 %v1945_v51, %v1944_v47  ;;  %v2876_v20 = vpop.f32.mrb[84].mxu0  ;;  %v3026_v25 = vld [vmem:[#allocation2 + $0xd8] sm:$0xff]   ;;  %v3027_v47 = vld [vmem:[#allocation2 + $0x120] sm:$0xff]  }
 0xc64   :  { %v1906_v22 = vadd.f32 %v2876_v20, %v4150_v56  ;;  %v1897_v62 = vpop.f32.mrb[85].mxu0  ;;  %v3028_v51 = vld [vmem:[#allocation2 + $0xe0] sm:$0xff]   ;;  %v3031_v20 = vld [vmem:[#allocation2 + $0x130] sm:$0xff]  }
 0xc65   :  { %v1898_v15 = vadd.f32 %v1897_v62, %v4150_v56  ;;  %v2877_v23 = vpop.f32.mrb[86].mxu0  ;;  %2887 = vmatpush3.bf16.msra.mxu0 %v1960_v42  ;;  %2907 = vmatpush3.bf16.msra.mxu1 %v1960_v42  ;;  %v3030_v42 = vld [vmem:[#allocation2 + $0xe8] sm:$0xff]   ;;  %v3033_v62 = vld [vmem:[#allocation2 + $0x138] sm:$0xff]  }
 0xc66   :  { %v1909_v46 = vadd.f32 %v2877_v23, %v4150_v56  ;;  %v1900_v61 = vpop.f32.mrb[87].mxu0  ;;  %2888 = vmatprep.subr.bf16.mxu0 %v3264_v32  ;;  %2908 = vmatprep.subr.bf16.mxu1 %v3264_v32  ;;  %v1950_v63 = vmax.f32 %v1906_v22, 0.0  ;;  %v3032_v22 = vld [vmem:[#allocation2 + $0xf0] sm:$0xff]  }
 0xc67   :  { %v1901_v38 = vadd.f32 %v1900_v61, %v4150_v56  ;;  %v1948_v52 = vmax.f32 %v1898_v15, 0.0  ;;  %v3034_v15 = vld [vmem:[#allocation2 + $0xf8] sm:$0xff]   ;;  %v3035_v61 = vld [vmem:[#allocation2 + $0x140] sm:$0xff]  }
 0xc68   :  { %v1951_v44 = vmax.f32 %v1909_v46, 0.0 }
 0xc69   :  { %v1949_v49 = vmax.f32 %v1901_v38, 0.0  ;;  %2889 = vmatpush3.bf16.msra.mxu0 %v1961_v41  ;;  %2909 = vmatpush3.bf16.msra.mxu1 %v1961_v41  ;;  %v3029_v41 = vld [vmem:[#allocation2 + $0x128] sm:$0xff]  }
 0xc6a   :  { %v1963_v21 = vpack.c.bf16 %v1951_v44, %v1950_v63  ;;  %2890 = vmatprep.subr.bf16.mxu0 %v3264_v32  ;;  %2910 = vmatprep.subr.bf16.mxu1 %v3264_v32 }
 0xc6b   :  { %v1962_v17 = vpack.c.bf16 %v1949_v49, %v1948_v52  ;;  %v2880_v50 = vpop.f32.mrb[88].mxu0 }
 0xc6c   :  { %v1922_v45 = vadd.f32 %v2880_v50, %v4150_v56  ;;  %v1913_v59 = vpop.f32.mrb[89].mxu0 }
 0xc6d   :  { %v1914_v9 = vadd.f32 %v1913_v59, %v4150_v56  ;;  %v2881_v13 = vpop.f32.mrb[90].mxu0  ;;  %2891 = vmatpush3.bf16.msra.mxu0 %v1962_v17  ;;  %2911 = vmatpush3.bf16.msra.mxu1 %v1962_v17  ;;  %v3037_v59 = vld [vmem:[#allocation2 + $0x150] sm:$0xff]  }
 0xc6e   :  { %v1925_v57 = vadd.f32 %v2881_v13, %v4150_v56  ;;  %v1916_v0 = vpop.f32.mrb[91].mxu0  ;;  %2892 = vmatprep.subr.bf16.mxu0 %v3264_v32  ;;  %2912 = vmatprep.subr.bf16.mxu1 %v3264_v32  ;;  %v1954_v3 = vmax.f32 %v1922_v45, 0.0  ;;  %v3036_v45 = vld [vmem:[#allocation2 + $0x148] sm:$0xff]   ;;  %v3039_v13 = vld [vmem:[#allocation2 + $0x160] sm:$0xff]  }
 0xc6f   :  { %v1917_v55 = vadd.f32 %v1916_v0, %v4150_v56  ;;  %v1952_v39 = vmax.f32 %v1914_v9, 0.0  ;;  %v3038_v9 = vld [vmem:[#allocation2 + $0x158] sm:$0xff]   ;;  %v3041_v0 = vld [vmem:[#allocation2 + $0x170] sm:$0xff]  }
 0xc70   :  { %v1955_v29 = vmax.f32 %v1925_v57, 0.0  ;;  %v3040_v57 = vld [vmem:[#allocation2 + $0x168] sm:$0xff]  }
 0xc71   :  { %v1953_v53 = vmax.f32 %v1917_v55, 0.0  ;;  %2893 = vmatpush3.bf16.msra.mxu0 %v1963_v21  ;;  %2913 = vmatpush3.bf16.msra.mxu1 %v1963_v21  ;;  %v3042_v55 = vld [vmem:[#allocation2 + $0x178] sm:$0xff]  }
 0xc72   :  { %v1965_v36 = vpack.c.bf16 %v1955_v29, %v1954_v3  ;;  %2894 = vmatprep.subr.bf16.mxu0 %v3264_v32  ;;  %2914 = vmatprep.subr.bf16.mxu1 %v3264_v32  ;;  %v2304_v3 = vrot.slane %v4145_v43, %v279_v35  ;;  %v2299_v29 = vpop.permute.xlu1 %2298  ;;  %v2317_v35 = vrot.slane %v4145_v43, %v986_v1 }
 0xc73   :  { %v1964_v14 = vpack.c.bf16 %v1953_v53, %v1952_v39  ;;  %v2884_v54 = vpop.f32.mrb[92].mxu0 }
 0xc74   :  { %v1938_v58 = vadd.f32 %v2884_v54, %v4150_v56  ;;  %v1929_v8 = vpop.f32.mrb[93].mxu0  ;;  %v2310_v54 = vrot.slane %v4145_v43, %v599_v18 }
 0xc75   :  { %v1930_v6 = vadd.f32 %v1929_v8, %v4150_v56  ;;  %v2885_v24 = vpop.f32.mrb[94].mxu0  ;;  %2895 = vmatpush3.bf16.msra.mxu0 %v1964_v14  ;;  %2915 = vmatpush3.bf16.msra.mxu1 %v1964_v14 }
 0xc76   :  { %v1941_v7 = vadd.f32 %v2885_v24, %v4150_v56  ;;  %v1932_v16 = vpop.f32.mrb[95].mxu0  ;;  %2896 = vmatprep.subr.bf16.mxu0 %v3264_v32  ;;  %2916 = vmatprep.subr.bf16.mxu1 %v3264_v32  ;;  %v1958_v19 = vmax.f32 %v1938_v58, 0.0 }
 0xc77   :  { %v1933_v28 = vadd.f32 %v1932_v16, %v4150_v56  ;;  %v1956_v26 = vmax.f32 %v1930_v6, 0.0  ;;  %v3020_v56 = vld [vmem:[#allocation2 + $0xc0] sm:$0xff]  }
 0xc78   :  { %v1959_v10 = vmax.f32 %v1941_v7, 0.0 }
 0xc79   :  { %v1957_v48 = vmax.f32 %v1933_v28, 0.0  ;;  %2897 = vmatpush3.bf16.msra.mxu0 %v1965_v36  ;;  %2917 = vmatpush3.bf16.msra.mxu1 %v1965_v36  ;;  %v2305_v36 = vmul.f32 %v2304_v3, %v2299_v29 }
 0xc7a   :  { %v1967_v4 = vpack.c.bf16 %v1959_v10, %v1958_v19  ;;  %2898 = vmatprep.subr.bf16.mxu0 %v3264_v32  ;;  %2918 = vmatprep.subr.bf16.mxu1 %v3264_v32 }
 0xc7b   :  { %v1966_v11 = vpack.c.bf16 %v1957_v48, %v1956_v26 }
 0xc7d   :  { %2899 = vmatpush3.bf16.msra.mxu0 %v1966_v11  ;;  %2919 = vmatpush3.bf16.msra.mxu1 %v1966_v11 }
 0xc7e   :  { %2900 = vmatprep.subr.bf16.mxu0 %v3264_v32  ;;  %2920 = vmatprep.subr.bf16.mxu1 %v3264_v32 }
 0xc81   :  { %2901 = vmatpush3.bf16.msra.mxu0 %v1967_v4  ;;  %2921 = vmatpush3.bf16.msra.mxu1 %v1967_v4 }
 0xc82   :  { %2926 = vmatprep.subr.bf16.mxu0 %v3264_v32  ;;  %2946 = vmatprep.subr.bf16.mxu1 %v3264_v32 }
 0xc84   :  { %2903 = vmatmul.mubr.msk.bf16.vlgmr.msra.gmra.mrb[96].mxu0 %vm2438_vm11, %v3267_v37  ;;  %2923 = vmatmul.mubr.msk.bf16.vlgmr.msra.gmra.mrb[12].mxu1 %vm2440_vm8, %v3267_v37 }
 0xc85   :  { %2927 = vmatpush3.bf16.msra.mxu0 %v3019_v33  ;;  %2947 = vmatpush3.bf16.msra.mxu1 %v3020_v56 }
 0xc86   :  { %2928 = vmatprep.subr.bf16.mxu0 %v3264_v32  ;;  %2948 = vmatprep.subr.bf16.mxu1 %v3264_v32 }
 0xc87   :  { %2942 = vmatprep.mubr.msk.bf16.mxu0 %vm4246_vm15, %v3264_v32  ;;  %2962 = vmatprep.mubr.msk.bf16.mxu1 %vm4246_vm15, %v3264_v32 }
 0xc89   :  { %2929 = vmatpush3.bf16.msra.mxu0 %v3021_v31  ;;  %2949 = vmatpush3.bf16.msra.mxu1 %v3022_v30 }
 0xc8a   :  { %2930 = vmatprep.subr.bf16.mxu0 %v3264_v32  ;;  %2950 = vmatprep.subr.bf16.mxu1 %v3264_v32 }
 0xc8d   :  { %2931 = vmatpush3.bf16.msra.mxu0 %v3023_v12  ;;  %2951 = vmatpush3.bf16.msra.mxu1 %v3024_v5 }
 0xc8e   :  { %2932 = vmatprep.subr.bf16.mxu0 %v3264_v32  ;;  %2952 = vmatprep.subr.bf16.mxu1 %v3264_v32 }
 0xc91   :  { %2933 = vmatpush3.bf16.msra.mxu0 %v3025_v27  ;;  %2953 = vmatpush3.bf16.msra.mxu1 %v3026_v25 }
 0xc92   :  { %2934 = vmatprep.subr.bf16.mxu0 %v3264_v32  ;;  %2954 = vmatprep.subr.bf16.mxu1 %v3264_v32 }
 0xc95   :  { %2935 = vmatpush3.bf16.msra.mxu0 %v3027_v47  ;;  %2955 = vmatpush3.bf16.msra.mxu1 %v3028_v51 }
 0xc96   :  { %2936 = vmatprep.subr.bf16.mxu0 %v3264_v32  ;;  %2956 = vmatprep.subr.bf16.mxu1 %v3264_v32 }
 0xc99   :  { %2937 = vmatpush3.bf16.msra.mxu0 %v3029_v41  ;;  %2957 = vmatpush3.bf16.msra.mxu1 %v3030_v42 }
 0xc9a   :  { %2938 = vmatprep.subr.bf16.mxu0 %v3264_v32  ;;  %2958 = vmatprep.subr.bf16.mxu1 %v3264_v32 }
 0xc9d   :  { %2939 = vmatpush3.bf16.msra.mxu0 %v3031_v20  ;;  %2959 = vmatpush3.bf16.msra.mxu1 %v3032_v22 }
 0xc9e   :  { %2940 = vmatprep.subr.bf16.mxu0 %v3264_v32  ;;  %2960 = vmatprep.subr.bf16.mxu1 %v3264_v32 }
 0xca1   :  { %2941 = vmatpush3.bf16.msra.mxu0 %v3033_v62  ;;  %2961 = vmatpush3.bf16.msra.mxu1 %v3034_v15 }
 0xca2   :  { %2966 = vmatprep.subr.bf16.mxu0 %v3264_v32 }
 0xd57   :  { %v2020_v23 = vpop.f32.mrb[96].mxu0  ;;  %v2060_v46 = vpop.f32.mrb[12].mxu1 }
 0xd58   :  { %v2117_v38 = vpack.c.bf16 %v2020_v23, %v2020_v23  ;;  %v2118_v63 = vpack.c.bf16 %v2060_v46, %v2060_v46  ;;  %v2904_v44 = vpop.f32.mrb[97].mxu0  ;;  %v2924_v52 = vpop.f32.mrb[13].mxu1 }
 0xd59   :  { %v2023_v49 = vpop.f32.mrb[98].mxu0  ;;  %v2063_v21 = vpop.f32.mrb[14].mxu1 }
 0xd5a   :  { %v2905_v17 = vpop.f32.mrb[99].mxu0  ;;  %v2925_v50 = vpop.f32.mrb[15].mxu1  ;;  %2943 = vmatmul.mubr.bf16.vlgmr.msra.gmra.mrb[100].mxu0 %v2118_v63  ;;  %2963 = vmatmul.mubr.bf16.vlgmr.msra.gmra.mrb[16].mxu1 %v2117_v38 }
 0xd5b   :  { %2967 = vmatpush3.bf16.msra.mxu0 %v3035_v61  ;;  %2982 = vmatprep.mubr.msk.bf16.mxu0 %vm4246_vm15, %v3264_v32 }
 0xd5c   :  { %2968 = vmatprep.subr.bf16.mxu0 %v3264_v32 }
 0xd5f   :  { %2969 = vmatpush3.bf16.msra.mxu0 %v3036_v45 }
 0xd60   :  { %2970 = vmatprep.subr.bf16.mxu0 %v3264_v32 }
 0xd63   :  { %2971 = vmatpush3.bf16.msra.mxu0 %v3037_v59 }
 0xd64   :  { %2972 = vmatprep.subr.bf16.mxu0 %v3264_v32 }
 0xd67   :  { %2973 = vmatpush3.bf16.msra.mxu0 %v3038_v9 }
 0xd68   :  { %2974 = vmatprep.subr.bf16.mxu0 %v3264_v32 }
 0xd6b   :  { %2975 = vmatpush3.bf16.msra.mxu0 %v3039_v13 }
 0xd6c   :  { %2976 = vmatprep.subr.bf16.mxu0 %v3264_v32 }
 0xd6f   :  { %2977 = vmatpush3.bf16.msra.mxu0 %v3040_v57 }
 0xd70   :  { %2978 = vmatprep.subr.bf16.mxu0 %v3264_v32 }
 0xd73   :  { %2979 = vmatpush3.bf16.msra.mxu0 %v3041_v0 }
 0xd74   :  { %2980 = vmatprep.subr.bf16.mxu0 %v3264_v32 }
 0xd77   :  { %2981 = vmatpush3.bf16.msra.mxu0 %v3042_v55 }
 0xe2d   :  { %v2201_v39 = vpop.f32.mrb[100].mxu0  ;;  %v2289_v53 = vpop.f32.mrb[16].mxu1 }
 0xe2e   :  { %v2290_v14 = vadd.f32 %v2289_v53, %v2201_v39  ;;  %v2944_v58 = vpop.f32.mrb[101].mxu0  ;;  %v2964_v8 = vpop.f32.mrb[17].mxu1 }
 0xe2f   :  { %v2204_v6 = vpop.f32.mrb[102].mxu0  ;;  %v2292_v24 = vpop.f32.mrb[18].mxu1 }
 0xe30   :  { %v2306_v7 = vadd.f32 %v2305_v36, %v2290_v14  ;;  %v2945_v32 = vpop.f32.mrb[103].mxu0  ;;  %v2965_v16 = vpop.f32.mrb[19].mxu1 }
 0xe32   :  { %v2311_v28 = vadd.f32 %v2310_v54, %v2306_v7 }
 0xe34   :  { %v2312_v19 = vmax.f32 %v2311_v28, 0.0 }
 0xe36   :  { %v2313_v10 = vpack.c.bf16 %v2312_v19, %v2312_v19 }
 0xe38   :  { %2983 = vmatmul.mubr.bf16.vlgmr.msra.gmra.mrb[104].mxu0 %v2313_v10 }
 0xf0b   :  { %v2400_v26 = vpop.f32.mrb[104].mxu0 }
 0xf0c   :  { %v2401_v48 = vadd.f32 %v2400_v26, %v2317_v35  ;;  %v2984_v40 = vpop.f32.mrb[105].mxu0 }
 0xf0d   :  { %v2403_v4 = vpop.f32.mrb[106].mxu0 }
 0xf0e   :  { %2406 = vst [vmem:[%s4232_s7] sm:$0xff] %v2401_v48  ;;  %v2985_v18 = vpop.f32.mrb[107].mxu0 }
 0xf0f   :  { %2411 = vsyncpa [#allocation3], 1 }

</bundles_post_ra>
